<compile_context>
chip_gen: v5e
topology: v5e:2x2
jax: 0.10.0
libtpu: 0.0.40
codegen_flags: <defaults>
</compile_context>

<pallas_src>
import jax
import jax.numpy as jnp
import numpy as np
from jax.experimental import pallas as pl
from jax.experimental.pallas import tpu as pltpu


# ---------------------------------------------------------------------------
# Fused kernel: conv1+relu+pool1 + conv2+relu+pool2 + fc1+fc2+fc3  (one sample)
# ---------------------------------------------------------------------------
def _lenet_kernel(x_ref, w1_ref, w2_ref, f1_ref, f2_ref, f3_ref, b_ref, out_ref):
    f32, bf16 = jnp.float32, jnp.bfloat16

    xv = x_ref[...]           # [4, 1, 8, 128] bf16 : (h%4, sample, h//4, w*4+ci)
    bv = b_ref[...]           # [8, 256] f32 packed biases

    b1 = bv[0:1, :]           # conv1 bias, lanes s*128 + v*8 + co
    b2 = bv[1:2, :]           # conv2 bias, lanes s*128 + u*16 + c2
    bf1 = bv[2:3, 0:128]
    bf2 = bv[3:4, 0:128]
    bf3 = bv[4:5, 0:128]

    # ---- conv1 (3->6, 5x5) + ReLU + 2x2 max-pool, fused --------------------
    # conv row y = 4*T + 2*q + p with T in [0,7). For each (q, p) phase one
    # [7, 640] x [640, 256] MXU matmul; output lanes pack (x%2 half, x//2, co),
    # so pooling over x = max of the two aligned 128-lane halves, pooling over
    # y = max over the p phases.  pool1[q][T, X*8 + c1] = pooled row Y = 2T+q.
    pool1 = [None, None]
    for q in range(2):
        for p in range(2):
            slabs = []
            for i in range(5):
                e = 2 * q + p + i                       # input row = 4*T + e
                slabs.append(xv[e % 4, 0, e // 4:e // 4 + 7, :])   # [7, 128]
            lhs = jnp.concatenate(slabs, axis=1)        # [7, 640] bf16
            r = jnp.dot(lhs, w1_ref[...], preferred_element_type=f32)  # [7, 256]
            r = jnp.maximum(r + b1, 0.0)
            m = jnp.maximum(r[:, 0:128], r[:, 128:256])             # pool over x
            pool1[q] = m if p == 0 else jnp.maximum(pool1[q], m)    # pool over y

    # ---- conv2 (6->16, 5x5) + ReLU + 2x2 max-pool, fused -------------------
    # conv2 row y2 = 2*Y2 + p2, Y2 in [0,5); one [5,640] x [640,256] matmul per
    # p2 phase, same half/phase pooling trick.  pool2[Y2, u*16 + c2].
    pool2 = None
    for p2 in range(2):
        slabs = []
        for i in range(5):
            e = p2 + i                                  # pool1 row = 2*Y2 + e
            slabs.append(pool1[e % 2][e // 2:e // 2 + 5, :])        # [5, 128]
        lhs2 = jnp.concatenate(slabs, axis=1).astype(bf16)          # [5, 640]
        r2 = jnp.dot(lhs2, w2_ref[...], preferred_element_type=f32)  # [5, 256]
        r2 = jnp.maximum(r2 + b2, 0.0)
        m2 = jnp.maximum(r2[:, 0:128], r2[:, 128:256])
        pool2 = m2 if p2 == 0 else jnp.maximum(pool2, m2)

    # ---- fc1 (400->120) as one K-stacked dot, then fc2, fc3 ----------------
    lhs_fc1 = jnp.concatenate([pool2[k:k + 1, :] for k in range(5)],
                              axis=1).astype(bf16)                  # [1, 640]
    h = jnp.maximum(jnp.dot(lhs_fc1, f1_ref[...],
                            preferred_element_type=f32) + bf1, 0.0)
    h = jnp.maximum(jnp.dot(h.astype(bf16), f2_ref[...],
                            preferred_element_type=f32) + bf2, 0.0)
    o = jnp.dot(h.astype(bf16), f3_ref[...],
                preferred_element_type=f32) + bf3                   # [1, 128]
    out_ref[...] = jnp.broadcast_to(o, (1, 8, 128))


# ---------------------------------------------------------------------------
# One-time weight repacking into Toeplitz / K-stacked lane-dense slabs
# ---------------------------------------------------------------------------
def pack_params(p):
    f32 = np.float32
    w1 = np.asarray(p["conv1_w"], f32)                   # [6, 3, 5, 5]
    w2 = np.asarray(p["conv2_w"], f32)                   # [16, 6, 5, 5]
    f1 = np.asarray(p["fc1_w"], f32).reshape(120, 16, 5, 5)   # [n, c2, Y2, u]
    f2 = np.asarray(p["fc2_w"], f32)                     # [84, 120]
    f3 = np.asarray(p["fc3_w"], f32)                     # [10, 84]

    # conv1 Toeplitz slab: K = i*128 + w*4 + ci, N = s*128 + v*8 + co (x = 2v+s)
    W1 = np.zeros((640, 256), f32)
    for i in range(5):
        for j in range(5):
            blk = w1[:, :, i, j].T                       # [ci=3, co=6]
            for s in range(2):
                for v in range(14):
                    w_in = 2 * v + s + j                 # input column < 32
                    W1[i * 128 + w_in * 4:i * 128 + w_in * 4 + 3,
                       s * 128 + v * 8:s * 128 + v * 8 + 6] = blk

    # conv2 Toeplitz slab: K = i*128 + X*8 + c1, N = s*128 + u*16 + c2 (x2 = 2u+s)
    W2 = np.zeros((640, 256), f32)
    for i in range(5):
        for j in range(5):
            blk = w2[:, :, i, j].T                       # [c1=6, c2=16]
            for s in range(2):
                for u in range(5):
                    X_in = 2 * u + s + j                 # pool1 column < 14
                    W2[i * 128 + X_in * 8:i * 128 + X_in * 8 + 6,
                       s * 128 + u * 16:s * 128 + u * 16 + 16] = blk

    # fc1 K-stacked: K = Y2*128 + u*16 + c2 (matches pool2 lanes), N = n (<120)
    F1 = np.zeros((640, 128), f32)
    for Y2 in range(5):
        for u in range(5):
            F1[Y2 * 128 + u * 16:Y2 * 128 + u * 16 + 16, :120] = f1[:, :, Y2, u].T

    F2 = np.zeros((128, 128), f32); F2[:120, :84] = f2.T
    F3 = np.zeros((128, 128), f32); F3[:84, :10] = f3.T

    bias = np.zeros((8, 256), f32)
    b1 = np.asarray(p["conv1_b"], f32)
    b2 = np.asarray(p["conv2_b"], f32)
    for s in range(2):
        for v in range(14):
            bias[0, s * 128 + v * 8:s * 128 + v * 8 + 6] = b1
        for u in range(5):
            bias[1, s * 128 + u * 16:s * 128 + u * 16 + 16] = b2
    bias[2, :120] = np.asarray(p["fc1_b"], f32)
    bias[3, :84] = np.asarray(p["fc2_b"], f32)
    bias[4, :10] = np.asarray(p["fc3_b"], f32)

    bf16 = jnp.bfloat16
    return {"w1": jnp.asarray(W1, bf16), "w2": jnp.asarray(W2, bf16),
            "f1": jnp.asarray(F1, bf16), "f2": jnp.asarray(F2, bf16),
            "f3": jnp.asarray(F3, bf16), "bias": jnp.asarray(bias, jnp.float32)}


# ---------------------------------------------------------------------------
# Forward wrapper
# ---------------------------------------------------------------------------
def _pack_input(x):
    """x: [B, 3, 32, 32] NCHW -> [4, B, 8, 128] bf16 with lane = w*4 + ci and
    rows split by h % 4 (row h = 4*t + q)."""
    B = x.shape[0]
    xt = jnp.transpose(x, (0, 2, 3, 1))                      # [B, 32, 32, 3]
    xt = jnp.pad(xt, ((0, 0), (0, 0), (0, 0), (0, 1)))       # [B, 32, 32, 4]
    xt = xt.reshape(B, 32, 128)                              # lane = w*4 + ci
    xt = xt.reshape(B, 8, 4, 128).transpose(2, 0, 1, 3)      # [4, B, 8, 128]
    return xt.astype(jnp.bfloat16)


def net_forward(packed, x):
    """x: [B, 3, 32, 32] -> logits [B, 10]; whole net in one pallas_call."""
    B = x.shape[0]
    xp = _pack_input(x)
    out = pl.pallas_call(
        _lenet_kernel,
        out_shape=jax.ShapeDtypeStruct((B, 8, 128), jnp.float32),
        grid=(B,),
        in_specs=[
            pl.BlockSpec((4, 1, 8, 128), lambda b: (0, b, 0, 0)),   # packed input
            pl.BlockSpec((640, 256), lambda b: (0, 0)),             # conv1 Toeplitz
            pl.BlockSpec((640, 256), lambda b: (0, 0)),             # conv2 Toeplitz
            pl.BlockSpec((640, 128), lambda b: (0, 0)),             # fc1 (K-stacked)
            pl.BlockSpec((128, 128), lambda b: (0, 0)),             # fc2
            pl.BlockSpec((128, 128), lambda b: (0, 0)),             # fc3
            pl.BlockSpec((8, 256), lambda b: (0, 0)),               # packed biases
        ],
        out_specs=pl.BlockSpec((1, 8, 128), lambda b: (b, 0, 0)),
        compiler_params=pltpu.CompilerParams(
            dimension_semantics=("parallel",),
            vmem_limit_bytes=32 * 1024 * 1024,
        ),
    )(xp, packed["w1"], packed["w2"], packed["f1"], packed["f2"],
      packed["f3"], packed["bias"])
    return out[:, 0, :10]


# ---------------------------------------------------------------------------
# Parameter init (deterministic, synthetic, PyTorch-shaped)
# ---------------------------------------------------------------------------
def init_params(key):
    ks = jax.random.split(key, 10)

    def w(k, shape, fan_in):
        return (jax.random.normal(k, shape, jnp.float32) /
                jnp.sqrt(fan_in)).astype(jnp.float32)

    return {
        "conv1_w": w(ks[0], (6, 3, 5, 5), 3 * 5 * 5),
        "conv1_b": w(ks[1], (6,), 3 * 5 * 5),
        "conv2_w": w(ks[2], (16, 6, 5, 5), 6 * 5 * 5),
        "conv2_b": w(ks[3], (16,), 6 * 5 * 5),
        "fc1_w": w(ks[4], (120, 400), 400),
        "fc1_b": w(ks[5], (120,), 400),
        "fc2_w": w(ks[6], (84, 120), 120),
        "fc2_b": w(ks[7], (84,), 120),
        "fc3_w": w(ks[8], (10, 84), 84),
        "fc3_b": w(ks[9], (10,), 84),
    }


if __name__ == "__main__":
    key = jax.random.PRNGKey(0)
    pkey, xkey = jax.random.split(key)
    params = init_params(pkey)
    packed = pack_params(params)          # one-time weight repacking
    # 32x32 spatial input is required by the 16*5*5 flatten in the original Net.
    x = jax.random.normal(xkey, (2, 3, 32, 32), jnp.float32)

    out = jax.jit(net_forward)(packed, x)
    out = jax.block_until_ready(out)
    assert out.shape == (2, 10), out.shape
    assert out.dtype == jnp.float32
    assert bool(jnp.all(jnp.isfinite(out)))
    print("KERNEL_OK")
</pallas_src>

<mosaic_0001>
module attributes {stable_mosaic.version = 11 : i64} {
  func.func @_lenet_kernel(%arg0: i32, %arg1: memref<4x1x8x128xbf16, #tpu.memory_space<vmem>>, %arg2: memref<640x256xbf16, #tpu.memory_space<vmem>>, %arg3: memref<640x256xbf16, #tpu.memory_space<vmem>>, %arg4: memref<640x128xbf16, #tpu.memory_space<vmem>>, %arg5: memref<128x128xbf16, #tpu.memory_space<vmem>>, %arg6: memref<128x128xbf16, #tpu.memory_space<vmem>>, %arg7: memref<8x256xf32, #tpu.memory_space<vmem>>, %arg8: memref<1x8x128xf32, #tpu.memory_space<vmem>>) attributes {dimension_semantics = [#tpu.dimension_semantics<parallel>], iteration_bounds = array<i64: 2>, scalar_prefetch = 0 : i64, scratch_operands = 0 : i64, tpu.core_type = #tpu.core_type<tc>, window_params = [{transform_indices = @transform_0, window_bounds = array<i64: 4, 1, 8, 128>}, {pipeline_mode = #tpu.pipeline_mode<synchronous>, transform_indices = @transform_1, window_bounds = array<i64: 640, 256>}, {pipeline_mode = #tpu.pipeline_mode<synchronous>, transform_indices = @transform_2, window_bounds = array<i64: 640, 256>}, {pipeline_mode = #tpu.pipeline_mode<synchronous>, transform_indices = @transform_3, window_bounds = array<i64: 640, 128>}, {pipeline_mode = #tpu.pipeline_mode<synchronous>, transform_indices = @transform_4, window_bounds = array<i64: 128, 128>}, {pipeline_mode = #tpu.pipeline_mode<synchronous>, transform_indices = @transform_5, window_bounds = array<i64: 128, 128>}, {pipeline_mode = #tpu.pipeline_mode<synchronous>, transform_indices = @transform_6, window_bounds = array<i64: 8, 256>}, {transform_indices = @transform_7, window_bounds = array<i64: 1, 8, 128>}]} {
    %c0 = arith.constant 0 : index
    %c0_0 = arith.constant 0 : index
    %c0_1 = arith.constant 0 : index
    %c0_2 = arith.constant 0 : index
    %0 = vector.load %arg1[%c0, %c0_0, %c0_1, %c0_2] : memref<4x1x8x128xbf16, #tpu.memory_space<vmem>>, vector<4x1x8x128xbf16>
    %c0_3 = arith.constant 0 : index
    %c0_4 = arith.constant 0 : index
    %1 = vector.load %arg7[%c0_3, %c0_4] : memref<8x256xf32, #tpu.memory_space<vmem>>, vector<8x256xf32>
    %2 = vector.extract_strided_slice %1 {offsets = [0, 0], sizes = [1, 256], strides = [1, 1]} : vector<8x256xf32> to vector<1x256xf32>
    %3 = vector.extract_strided_slice %1 {offsets = [1, 0], sizes = [1, 256], strides = [1, 1]} : vector<8x256xf32> to vector<1x256xf32>
    %4 = vector.extract_strided_slice %1 {offsets = [2, 0], sizes = [1, 128], strides = [1, 1]} : vector<8x256xf32> to vector<1x128xf32>
    %5 = vector.extract_strided_slice %1 {offsets = [3, 0], sizes = [1, 128], strides = [1, 1]} : vector<8x256xf32> to vector<1x128xf32>
    %6 = vector.extract_strided_slice %1 {offsets = [4, 0], sizes = [1, 128], strides = [1, 1]} : vector<8x256xf32> to vector<1x128xf32>
    %7 = vector.extract_strided_slice %0 {offsets = [0, 0, 0, 0], sizes = [1, 1, 7, 128], strides = [1, 1, 1, 1]} : vector<4x1x8x128xbf16> to vector<1x1x7x128xbf16>
    %8 = vector.shape_cast %7 : vector<1x1x7x128xbf16> to vector<7x128xbf16>
    %9 = vector.extract_strided_slice %0 {offsets = [1, 0, 0, 0], sizes = [1, 1, 7, 128], strides = [1, 1, 1, 1]} : vector<4x1x8x128xbf16> to vector<1x1x7x128xbf16>
    %10 = vector.shape_cast %9 : vector<1x1x7x128xbf16> to vector<7x128xbf16>
    %11 = vector.extract_strided_slice %0 {offsets = [2, 0, 0, 0], sizes = [1, 1, 7, 128], strides = [1, 1, 1, 1]} : vector<4x1x8x128xbf16> to vector<1x1x7x128xbf16>
    %12 = vector.shape_cast %11 : vector<1x1x7x128xbf16> to vector<7x128xbf16>
    %13 = vector.extract_strided_slice %0 {offsets = [3, 0, 0, 0], sizes = [1, 1, 7, 128], strides = [1, 1, 1, 1]} : vector<4x1x8x128xbf16> to vector<1x1x7x128xbf16>
    %14 = vector.shape_cast %13 : vector<1x1x7x128xbf16> to vector<7x128xbf16>
    %15 = vector.extract_strided_slice %0 {offsets = [0, 0, 1, 0], sizes = [1, 1, 7, 128], strides = [1, 1, 1, 1]} : vector<4x1x8x128xbf16> to vector<1x1x7x128xbf16>
    %16 = vector.shape_cast %15 : vector<1x1x7x128xbf16> to vector<7x128xbf16>
    %17 = tpu.concatenate %8, %10, %12, %14, %16 in 1 : vector<7x128xbf16>, vector<7x128xbf16>, vector<7x128xbf16>, vector<7x128xbf16>, vector<7x128xbf16> -> vector<7x640xbf16>
    %c0_5 = arith.constant 0 : index
    %c0_6 = arith.constant 0 : index
    %18 = vector.load %arg2[%c0_5, %c0_6] : memref<640x256xbf16, #tpu.memory_space<vmem>>, vector<640x256xbf16>
    %cst = arith.constant dense<0.000000e+00> : vector<7x256xf32>
    %19 = tpu.matmul %17, %18, %cst {dimension_numbers = #tpu.dot_dimension_numbers<[1], [0], [0], [1], [0, 0, 1, 1], [], []>} : vector<7x640xbf16>, vector<640x256xbf16>, vector<7x256xf32> -> vector<7x256xf32>
    %20 = vector.broadcast %2 : vector<1x256xf32> to vector<7x256xf32>
    %21 = arith.addf %19, %20 : vector<7x256xf32>
    %cst_7 = arith.constant 0.000000e+00 : f32
    %22 = vector.broadcast %cst_7 : f32 to vector<7x256xf32>
    %23 = arith.maximumf %21, %22 : vector<7x256xf32>
    %24 = vector.extract_strided_slice %23 {offsets = [0, 0], sizes = [7, 128], strides = [1, 1]} : vector<7x256xf32> to vector<7x128xf32>
    %25 = vector.extract_strided_slice %23 {offsets = [0, 128], sizes = [7, 128], strides = [1, 1]} : vector<7x256xf32> to vector<7x128xf32>
    %26 = arith.maximumf %24, %25 : vector<7x128xf32>
    %27 = vector.extract_strided_slice %0 {offsets = [1, 0, 0, 0], sizes = [1, 1, 7, 128], strides = [1, 1, 1, 1]} : vector<4x1x8x128xbf16> to vector<1x1x7x128xbf16>
    %28 = vector.shape_cast %27 : vector<1x1x7x128xbf16> to vector<7x128xbf16>
    %29 = vector.extract_strided_slice %0 {offsets = [2, 0, 0, 0], sizes = [1, 1, 7, 128], strides = [1, 1, 1, 1]} : vector<4x1x8x128xbf16> to vector<1x1x7x128xbf16>
    %30 = vector.shape_cast %29 : vector<1x1x7x128xbf16> to vector<7x128xbf16>
    %31 = vector.extract_strided_slice %0 {offsets = [3, 0, 0, 0], sizes = [1, 1, 7, 128], strides = [1, 1, 1, 1]} : vector<4x1x8x128xbf16> to vector<1x1x7x128xbf16>
    %32 = vector.shape_cast %31 : vector<1x1x7x128xbf16> to vector<7x128xbf16>
    %33 = vector.extract_strided_slice %0 {offsets = [0, 0, 1, 0], sizes = [1, 1, 7, 128], strides = [1, 1, 1, 1]} : vector<4x1x8x128xbf16> to vector<1x1x7x128xbf16>
    %34 = vector.shape_cast %33 : vector<1x1x7x128xbf16> to vector<7x128xbf16>
    %35 = vector.extract_strided_slice %0 {offsets = [1, 0, 1, 0], sizes = [1, 1, 7, 128], strides = [1, 1, 1, 1]} : vector<4x1x8x128xbf16> to vector<1x1x7x128xbf16>
    %36 = vector.shape_cast %35 : vector<1x1x7x128xbf16> to vector<7x128xbf16>
    %37 = tpu.concatenate %28, %30, %32, %34, %36 in 1 : vector<7x128xbf16>, vector<7x128xbf16>, vector<7x128xbf16>, vector<7x128xbf16>, vector<7x128xbf16> -> vector<7x640xbf16>
    %c0_8 = arith.constant 0 : index
    %c0_9 = arith.constant 0 : index
    %38 = vector.load %arg2[%c0_8, %c0_9] : memref<640x256xbf16, #tpu.memory_space<vmem>>, vector<640x256xbf16>
    %cst_10 = arith.constant dense<0.000000e+00> : vector<7x256xf32>
    %39 = tpu.matmul %37, %38, %cst_10 {dimension_numbers = #tpu.dot_dimension_numbers<[1], [0], [0], [1], [0, 0, 1, 1], [], []>} : vector<7x640xbf16>, vector<640x256xbf16>, vector<7x256xf32> -> vector<7x256xf32>
    %40 = vector.broadcast %2 : vector<1x256xf32> to vector<7x256xf32>
    %41 = arith.addf %39, %40 : vector<7x256xf32>
    %cst_11 = arith.constant 0.000000e+00 : f32
    %42 = vector.broadcast %cst_11 : f32 to vector<7x256xf32>
    %43 = arith.maximumf %41, %42 : vector<7x256xf32>
    %44 = vector.extract_strided_slice %43 {offsets = [0, 0], sizes = [7, 128], strides = [1, 1]} : vector<7x256xf32> to vector<7x128xf32>
    %45 = vector.extract_strided_slice %43 {offsets = [0, 128], sizes = [7, 128], strides = [1, 1]} : vector<7x256xf32> to vector<7x128xf32>
    %46 = arith.maximumf %44, %45 : vector<7x128xf32>
    %47 = arith.maximumf %26, %46 : vector<7x128xf32>
    %48 = vector.extract_strided_slice %0 {offsets = [2, 0, 0, 0], sizes = [1, 1, 7, 128], strides = [1, 1, 1, 1]} : vector<4x1x8x128xbf16> to vector<1x1x7x128xbf16>
    %49 = vector.shape_cast %48 : vector<1x1x7x128xbf16> to vector<7x128xbf16>
    %50 = vector.extract_strided_slice %0 {offsets = [3, 0, 0, 0], sizes = [1, 1, 7, 128], strides = [1, 1, 1, 1]} : vector<4x1x8x128xbf16> to vector<1x1x7x128xbf16>
    %51 = vector.shape_cast %50 : vector<1x1x7x128xbf16> to vector<7x128xbf16>
    %52 = vector.extract_strided_slice %0 {offsets = [0, 0, 1, 0], sizes = [1, 1, 7, 128], strides = [1, 1, 1, 1]} : vector<4x1x8x128xbf16> to vector<1x1x7x128xbf16>
    %53 = vector.shape_cast %52 : vector<1x1x7x128xbf16> to vector<7x128xbf16>
    %54 = vector.extract_strided_slice %0 {offsets = [1, 0, 1, 0], sizes = [1, 1, 7, 128], strides = [1, 1, 1, 1]} : vector<4x1x8x128xbf16> to vector<1x1x7x128xbf16>
    %55 = vector.shape_cast %54 : vector<1x1x7x128xbf16> to vector<7x128xbf16>
    %56 = vector.extract_strided_slice %0 {offsets = [2, 0, 1, 0], sizes = [1, 1, 7, 128], strides = [1, 1, 1, 1]} : vector<4x1x8x128xbf16> to vector<1x1x7x128xbf16>
    %57 = vector.shape_cast %56 : vector<1x1x7x128xbf16> to vector<7x128xbf16>
    %58 = tpu.concatenate %49, %51, %53, %55, %57 in 1 : vector<7x128xbf16>, vector<7x128xbf16>, vector<7x128xbf16>, vector<7x128xbf16>, vector<7x128xbf16> -> vector<7x640xbf16>
    %c0_12 = arith.constant 0 : index
    %c0_13 = arith.constant 0 : index
    %59 = vector.load %arg2[%c0_12, %c0_13] : memref<640x256xbf16, #tpu.memory_space<vmem>>, vector<640x256xbf16>
    %cst_14 = arith.constant dense<0.000000e+00> : vector<7x256xf32>
    %60 = tpu.matmul %58, %59, %cst_14 {dimension_numbers = #tpu.dot_dimension_numbers<[1], [0], [0], [1], [0, 0, 1, 1], [], []>} : vector<7x640xbf16>, vector<640x256xbf16>, vector<7x256xf32> -> vector<7x256xf32>
    %61 = vector.broadcast %2 : vector<1x256xf32> to vector<7x256xf32>
    %62 = arith.addf %60, %61 : vector<7x256xf32>
    %cst_15 = arith.constant 0.000000e+00 : f32
    %63 = vector.broadcast %cst_15 : f32 to vector<7x256xf32>
    %64 = arith.maximumf %62, %63 : vector<7x256xf32>
    %65 = vector.extract_strided_slice %64 {offsets = [0, 0], sizes = [7, 128], strides = [1, 1]} : vector<7x256xf32> to vector<7x128xf32>
    %66 = vector.extract_strided_slice %64 {offsets = [0, 128], sizes = [7, 128], strides = [1, 1]} : vector<7x256xf32> to vector<7x128xf32>
    %67 = arith.maximumf %65, %66 : vector<7x128xf32>
    %68 = vector.extract_strided_slice %0 {offsets = [3, 0, 0, 0], sizes = [1, 1, 7, 128], strides = [1, 1, 1, 1]} : vector<4x1x8x128xbf16> to vector<1x1x7x128xbf16>
    %69 = vector.shape_cast %68 : vector<1x1x7x128xbf16> to vector<7x128xbf16>
    %70 = vector.extract_strided_slice %0 {offsets = [0, 0, 1, 0], sizes = [1, 1, 7, 128], strides = [1, 1, 1, 1]} : vector<4x1x8x128xbf16> to vector<1x1x7x128xbf16>
    %71 = vector.shape_cast %70 : vector<1x1x7x128xbf16> to vector<7x128xbf16>
    %72 = vector.extract_strided_slice %0 {offsets = [1, 0, 1, 0], sizes = [1, 1, 7, 128], strides = [1, 1, 1, 1]} : vector<4x1x8x128xbf16> to vector<1x1x7x128xbf16>
    %73 = vector.shape_cast %72 : vector<1x1x7x128xbf16> to vector<7x128xbf16>
    %74 = vector.extract_strided_slice %0 {offsets = [2, 0, 1, 0], sizes = [1, 1, 7, 128], strides = [1, 1, 1, 1]} : vector<4x1x8x128xbf16> to vector<1x1x7x128xbf16>
    %75 = vector.shape_cast %74 : vector<1x1x7x128xbf16> to vector<7x128xbf16>
    %76 = vector.extract_strided_slice %0 {offsets = [3, 0, 1, 0], sizes = [1, 1, 7, 128], strides = [1, 1, 1, 1]} : vector<4x1x8x128xbf16> to vector<1x1x7x128xbf16>
    %77 = vector.shape_cast %76 : vector<1x1x7x128xbf16> to vector<7x128xbf16>
    %78 = tpu.concatenate %69, %71, %73, %75, %77 in 1 : vector<7x128xbf16>, vector<7x128xbf16>, vector<7x128xbf16>, vector<7x128xbf16>, vector<7x128xbf16> -> vector<7x640xbf16>
    %c0_16 = arith.constant 0 : index
    %c0_17 = arith.constant 0 : index
    %79 = vector.load %arg2[%c0_16, %c0_17] : memref<640x256xbf16, #tpu.memory_space<vmem>>, vector<640x256xbf16>
    %cst_18 = arith.constant dense<0.000000e+00> : vector<7x256xf32>
    %80 = tpu.matmul %78, %79, %cst_18 {dimension_numbers = #tpu.dot_dimension_numbers<[1], [0], [0], [1], [0, 0, 1, 1], [], []>} : vector<7x640xbf16>, vector<640x256xbf16>, vector<7x256xf32> -> vector<7x256xf32>
    %81 = vector.broadcast %2 : vector<1x256xf32> to vector<7x256xf32>
    %82 = arith.addf %80, %81 : vector<7x256xf32>
    %cst_19 = arith.constant 0.000000e+00 : f32
    %83 = vector.broadcast %cst_19 : f32 to vector<7x256xf32>
    %84 = arith.maximumf %82, %83 : vector<7x256xf32>
    %85 = vector.extract_strided_slice %84 {offsets = [0, 0], sizes = [7, 128], strides = [1, 1]} : vector<7x256xf32> to vector<7x128xf32>
    %86 = vector.extract_strided_slice %84 {offsets = [0, 128], sizes = [7, 128], strides = [1, 1]} : vector<7x256xf32> to vector<7x128xf32>
    %87 = arith.maximumf %85, %86 : vector<7x128xf32>
    %88 = arith.maximumf %67, %87 : vector<7x128xf32>
    %89 = vector.extract_strided_slice %47 {offsets = [0, 0], sizes = [5, 128], strides = [1, 1]} : vector<7x128xf32> to vector<5x128xf32>
    %90 = vector.extract_strided_slice %88 {offsets = [0, 0], sizes = [5, 128], strides = [1, 1]} : vector<7x128xf32> to vector<5x128xf32>
    %91 = vector.extract_strided_slice %47 {offsets = [1, 0], sizes = [5, 128], strides = [1, 1]} : vector<7x128xf32> to vector<5x128xf32>
    %92 = vector.extract_strided_slice %88 {offsets = [1, 0], sizes = [5, 128], strides = [1, 1]} : vector<7x128xf32> to vector<5x128xf32>
    %93 = vector.extract_strided_slice %47 {offsets = [2, 0], sizes = [5, 128], strides = [1, 1]} : vector<7x128xf32> to vector<5x128xf32>
    %94 = tpu.concatenate %89, %90, %91, %92, %93 in 1 : vector<5x128xf32>, vector<5x128xf32>, vector<5x128xf32>, vector<5x128xf32>, vector<5x128xf32> -> vector<5x640xf32>
    %95 = arith.truncf %94 : vector<5x640xf32> to vector<5x640xbf16>
    %c0_20 = arith.constant 0 : index
    %c0_21 = arith.constant 0 : index
    %96 = vector.load %arg3[%c0_20, %c0_21] : memref<640x256xbf16, #tpu.memory_space<vmem>>, vector<640x256xbf16>
    %cst_22 = arith.constant dense<0.000000e+00> : vector<5x256xf32>
    %97 = tpu.matmul %95, %96, %cst_22 {dimension_numbers = #tpu.dot_dimension_numbers<[1], [0], [0], [1], [0, 0, 1, 1], [], []>} : vector<5x640xbf16>, vector<640x256xbf16>, vector<5x256xf32> -> vector<5x256xf32>
    %98 = vector.broadcast %3 : vector<1x256xf32> to vector<5x256xf32>
    %99 = arith.addf %97, %98 : vector<5x256xf32>
    %cst_23 = arith.constant 0.000000e+00 : f32
    %100 = vector.broadcast %cst_23 : f32 to vector<5x256xf32>
    %101 = arith.maximumf %99, %100 : vector<5x256xf32>
    %102 = vector.extract_strided_slice %101 {offsets = [0, 0], sizes = [5, 128], strides = [1, 1]} : vector<5x256xf32> to vector<5x128xf32>
    %103 = vector.extract_strided_slice %101 {offsets = [0, 128], sizes = [5, 128], strides = [1, 1]} : vector<5x256xf32> to vector<5x128xf32>
    %104 = arith.maximumf %102, %103 : vector<5x128xf32>
    %105 = vector.extract_strided_slice %88 {offsets = [0, 0], sizes = [5, 128], strides = [1, 1]} : vector<7x128xf32> to vector<5x128xf32>
    %106 = vector.extract_strided_slice %47 {offsets = [1, 0], sizes = [5, 128], strides = [1, 1]} : vector<7x128xf32> to vector<5x128xf32>
    %107 = vector.extract_strided_slice %88 {offsets = [1, 0], sizes = [5, 128], strides = [1, 1]} : vector<7x128xf32> to vector<5x128xf32>
    %108 = vector.extract_strided_slice %47 {offsets = [2, 0], sizes = [5, 128], strides = [1, 1]} : vector<7x128xf32> to vector<5x128xf32>
    %109 = vector.extract_strided_slice %88 {offsets = [2, 0], sizes = [5, 128], strides = [1, 1]} : vector<7x128xf32> to vector<5x128xf32>
    %110 = tpu.concatenate %105, %106, %107, %108, %109 in 1 : vector<5x128xf32>, vector<5x128xf32>, vector<5x128xf32>, vector<5x128xf32>, vector<5x128xf32> -> vector<5x640xf32>
    %111 = arith.truncf %110 : vector<5x640xf32> to vector<5x640xbf16>
    %c0_24 = arith.constant 0 : index
    %c0_25 = arith.constant 0 : index
    %112 = vector.load %arg3[%c0_24, %c0_25] : memref<640x256xbf16, #tpu.memory_space<vmem>>, vector<640x256xbf16>
    %cst_26 = arith.constant dense<0.000000e+00> : vector<5x256xf32>
    %113 = tpu.matmul %111, %112, %cst_26 {dimension_numbers = #tpu.dot_dimension_numbers<[1], [0], [0], [1], [0, 0, 1, 1], [], []>} : vector<5x640xbf16>, vector<640x256xbf16>, vector<5x256xf32> -> vector<5x256xf32>
    %114 = vector.broadcast %3 : vector<1x256xf32> to vector<5x256xf32>
    %115 = arith.addf %113, %114 : vector<5x256xf32>
    %cst_27 = arith.constant 0.000000e+00 : f32
    %116 = vector.broadcast %cst_27 : f32 to vector<5x256xf32>
    %117 = arith.maximumf %115, %116 : vector<5x256xf32>
    %118 = vector.extract_strided_slice %117 {offsets = [0, 0], sizes = [5, 128], strides = [1, 1]} : vector<5x256xf32> to vector<5x128xf32>
    %119 = vector.extract_strided_slice %117 {offsets = [0, 128], sizes = [5, 128], strides = [1, 1]} : vector<5x256xf32> to vector<5x128xf32>
    %120 = arith.maximumf %118, %119 : vector<5x128xf32>
    %121 = arith.maximumf %104, %120 : vector<5x128xf32>
    %122 = vector.extract_strided_slice %121 {offsets = [0, 0], sizes = [1, 128], strides = [1, 1]} : vector<5x128xf32> to vector<1x128xf32>
    %123 = vector.extract_strided_slice %121 {offsets = [1, 0], sizes = [1, 128], strides = [1, 1]} : vector<5x128xf32> to vector<1x128xf32>
    %124 = vector.extract_strided_slice %121 {offsets = [2, 0], sizes = [1, 128], strides = [1, 1]} : vector<5x128xf32> to vector<1x128xf32>
    %125 = vector.extract_strided_slice %121 {offsets = [3, 0], sizes = [1, 128], strides = [1, 1]} : vector<5x128xf32> to vector<1x128xf32>
    %126 = vector.extract_strided_slice %121 {offsets = [4, 0], sizes = [1, 128], strides = [1, 1]} : vector<5x128xf32> to vector<1x128xf32>
    %127 = tpu.concatenate %122, %123, %124, %125, %126 in 1 : vector<1x128xf32>, vector<1x128xf32>, vector<1x128xf32>, vector<1x128xf32>, vector<1x128xf32> -> vector<1x640xf32>
    %128 = arith.truncf %127 : vector<1x640xf32> to vector<1x640xbf16>
    %c0_28 = arith.constant 0 : index
    %c0_29 = arith.constant 0 : index
    %129 = vector.load %arg4[%c0_28, %c0_29] : memref<640x128xbf16, #tpu.memory_space<vmem>>, vector<640x128xbf16>
    %cst_30 = arith.constant dense<0.000000e+00> : vector<1x128xf32>
    %130 = tpu.matmul %128, %129, %cst_30 {dimension_numbers = #tpu.dot_dimension_numbers<[1], [0], [0], [1], [0, 0, 1, 1], [], []>} : vector<1x640xbf16>, vector<640x128xbf16>, vector<1x128xf32> -> vector<1x128xf32>
    %131 = arith.addf %130, %4 : vector<1x128xf32>
    %cst_31 = arith.constant 0.000000e+00 : f32
    %132 = vector.broadcast %cst_31 : f32 to vector<1x128xf32>
    %133 = arith.maximumf %131, %132 : vector<1x128xf32>
    %134 = arith.truncf %133 : vector<1x128xf32> to vector<1x128xbf16>
    %c0_32 = arith.constant 0 : index
    %c0_33 = arith.constant 0 : index
    %135 = vector.load %arg5[%c0_32, %c0_33] : memref<128x128xbf16, #tpu.memory_space<vmem>>, vector<128x128xbf16>
    %cst_34 = arith.constant dense<0.000000e+00> : vector<1x128xf32>
    %136 = tpu.matmul %134, %135, %cst_34 {dimension_numbers = #tpu.dot_dimension_numbers<[1], [0], [0], [1], [0, 0, 1, 1], [], []>} : vector<1x128xbf16>, vector<128x128xbf16>, vector<1x128xf32> -> vector<1x128xf32>
    %137 = arith.addf %136, %5 : vector<1x128xf32>
    %cst_35 = arith.constant 0.000000e+00 : f32
    %138 = vector.broadcast %cst_35 : f32 to vector<1x128xf32>
    %139 = arith.maximumf %137, %138 : vector<1x128xf32>
    %140 = arith.truncf %139 : vector<1x128xf32> to vector<1x128xbf16>
    %c0_36 = arith.constant 0 : index
    %c0_37 = arith.constant 0 : index
    %141 = vector.load %arg6[%c0_36, %c0_37] : memref<128x128xbf16, #tpu.memory_space<vmem>>, vector<128x128xbf16>
    %cst_38 = arith.constant dense<0.000000e+00> : vector<1x128xf32>
    %142 = tpu.matmul %140, %141, %cst_38 {dimension_numbers = #tpu.dot_dimension_numbers<[1], [0], [0], [1], [0, 0, 1, 1], [], []>} : vector<1x128xbf16>, vector<128x128xbf16>, vector<1x128xf32> -> vector<1x128xf32>
    %143 = arith.addf %142, %6 : vector<1x128xf32>
    %144 = vector.shape_cast %143 : vector<1x128xf32> to vector<1x1x128xf32>
    %145 = vector.broadcast %144 : vector<1x1x128xf32> to vector<1x8x128xf32>
    %c0_39 = arith.constant 0 : index
    %c0_40 = arith.constant 0 : index
    %c0_41 = arith.constant 0 : index
    %146 = vector.load %arg8[%c0_39, %c0_40, %c0_41] : memref<1x8x128xf32, #tpu.memory_space<vmem>>, vector<1x8x128xf32>
    tpu.vector_store %arg8[%c0_39, %c0_40, %c0_41], %145 {strides = array<i32>} : memref<1x8x128xf32, #tpu.memory_space<vmem>>, vector<1x8x128xf32>,
    return
  }
  func.func @transform_0(%arg0: i32) -> (i32, i32, i32, i32) {
    %c0_i32 = arith.constant 0 : i32
    %c0_i32_0 = arith.constant 0 : i32
    %c0_i32_1 = arith.constant 0 : i32
    %c0_i32_2 = arith.constant 0 : i32
    return %c0_i32, %arg0, %c0_i32_0, %c0_i32_1 : i32, i32, i32, i32
  }
  func.func @transform_1(%arg0: i32) -> (i32, i32) {
    %c0_i32 = arith.constant 0 : i32
    %c0_i32_0 = arith.constant 0 : i32
    %c0_i32_1 = arith.constant 0 : i32
    return %c0_i32, %c0_i32_0 : i32, i32
  }
  func.func @transform_2(%arg0: i32) -> (i32, i32) {
    %c0_i32 = arith.constant 0 : i32
    %c0_i32_0 = arith.constant 0 : i32
    %c0_i32_1 = arith.constant 0 : i32
    return %c0_i32, %c0_i32_0 : i32, i32
  }
  func.func @transform_3(%arg0: i32) -> (i32, i32) {
    %c0_i32 = arith.constant 0 : i32
    %c0_i32_0 = arith.constant 0 : i32
    %c0_i32_1 = arith.constant 0 : i32
    return %c0_i32, %c0_i32_0 : i32, i32
  }
  func.func @transform_4(%arg0: i32) -> (i32, i32) {
    %c0_i32 = arith.constant 0 : i32
    %c0_i32_0 = arith.constant 0 : i32
    %c0_i32_1 = arith.constant 0 : i32
    return %c0_i32, %c0_i32_0 : i32, i32
  }
  func.func @transform_5(%arg0: i32) -> (i32, i32) {
    %c0_i32 = arith.constant 0 : i32
    %c0_i32_0 = arith.constant 0 : i32
    %c0_i32_1 = arith.constant 0 : i32
    return %c0_i32, %c0_i32_0 : i32, i32
  }
  func.func @transform_6(%arg0: i32) -> (i32, i32) {
    %c0_i32 = arith.constant 0 : i32
    %c0_i32_0 = arith.constant 0 : i32
    %c0_i32_1 = arith.constant 0 : i32
    return %c0_i32, %c0_i32_0 : i32, i32
  }
  func.func @transform_7(%arg0: i32) -> (i32, i32, i32) {
    %c0_i32 = arith.constant 0 : i32
    %c0_i32_0 = arith.constant 0 : i32
    %c0_i32_1 = arith.constant 0 : i32
    return %arg0, %c0_i32, %c0_i32_0 : i32, i32, i32
  }
}

</mosaic_0001>

<bundles_post_ra>
// kernel: net_forward.1
= control target key start
LH: loop header
LB: loop body
LE: loop exit
PB: predicated region body
PF: predicated region fallthrough
CT: control target
= control target key end

     0   :  { %s3969_s24 = smov 0   ;;  %s3971_s25 = smov 0   ;;  %s6125_s0 = inlined_call_operand.vmem [shape: bf16[4,2,8,128], index: 0, kind: input, shape index: {}]   ;;  %s6126_s1 = inlined_call_operand.vmem [shape: bf16[640,256], index: 1, kind: input, shape index: {}]   ;;  %s6127_s2 = inlined_call_operand.vmem [shape: bf16[640,256], index: 2, kind: input, shape index: {}]   ;;  %s6128_s3 = inlined_call_operand.vmem [shape: bf16[640,128], index: 3, kind: input, shape index: {}]   ;;  %s6129_s4 = inlined_call_operand.vmem [shape: bf16[128,128], index: 4, kind: input, shape index: {}]   ;;  %s6130_s5 = inlined_call_operand.vmem [shape: bf16[128,128], index: 5, kind: input, shape index: {}]   ;;  %s6131_s6 = inlined_call_operand.vmem [shape: f32[8,256], index: 6, kind: input, shape index: {}]   ;;  %s6132_s7 = inlined_call_operand.vmem [shape: f32[2,8,128], index: 7, kind: output, shape index: {}]  }
   0x1   :  { %s3973_s26 = smov 0  }
   0x2 LB: > { %s2788_s27 = sadd.s32 4294967295, %s3927_s26   ;;  %s3986_s28 = sadd.s32 1, %s3927_s26   ;;  %s3927_s26 = sphi %s3973_s26, %s6440_s26   ;;  %s3923_s25 = sphi %s3971_s25, %s6439_s25   ;;  %s3919_s24 = sphi %s3969_s24, %s6438_s24  }
   0x3   : > { %s21_s29 = ssub.s32 %s3927_s26, %s3986_s28  ;;  %s24_s30 = sadd.s32 1, %s3923_s25 }
   0x4   : > { %p22_p0 = scmp.eq.s32.totalorder %s21_s29, 0  ;;  %p31_p1 = scmp.ne.s32.totalorder %s3923_s25, %s3919_s24 }
   0x5   : > { %p32_p2 = scmp.eq.s32.totalorder %s3927_s26, 0  ;;  %p2791_p4 = scmp.ge.s32.totalorder %s3927_s26, 2 }
   0x6   : > { %s3995_s8 = scalar_select %p22_p0, %s3923_s25, %s24_s30  }
   0x7   : > { %p33_p3 = por %p32_p2, %p31_p1  ;;  %227 = sbr.rel (%p2791_p4) target bundleno = 20 (0x14), region = 40 }
   0xc   : > { %230 = sbr.rel (!%p33_p3) target bundleno = 20 (0x14), region = 44  ;;  %s232_s9 = sand.u32 (%p33_p3), 1, %s3923_s25  }
   0xd   : > { %s2793_s10 = sshll.u32 (%p33_p3), %s3927_s26, 2  ;;  %s2792_s11 = sshll.u32 (%p33_p3), %s232_s9, 4 }
   0xe   : > { %s236_s14 = scalar_lea.vmem (%p33_p3), %s6125_s0, %s2793_s10  ;;  %s234_s15 = scalar_lea.vmem (%p33_p3), [#allocation2], %s2792_s11 }
   0xf   : > { %v253_v0 = vld [vmem:[%s236_s14] sm:$0xf] (%p33_p3)  ;;  %v255_v1 = vld [vmem:[%s236_s14 + $0x8] sm:$0xf] (%p33_p3)  ;;  %v257_v2 = vld [vmem:[%s236_s14 + $0x10] sm:$0xf] (%p33_p3) }
  0x10   : > { %254 = vst [vmem:[%s234_s15] sm:$0xf] (%p33_p3), %v253_v0  ;;  %v259_v3 = vld [vmem:[%s236_s14 + $0x18] sm:$0xf] (%p33_p3) }
  0x11   : > { %256 = vst [vmem:[%s234_s15 + $0x4] sm:$0xf] %v255_v1 }
  0x12   : > { %258 = vst [vmem:[%s234_s15 + $0x8] sm:$0xf] %v257_v2 }
  0x13   : > { %260 = vst [vmem:[%s234_s15 + $0xc] sm:$0xf] %v259_v3 }
  0x14 PF: > { %p2794_p5 = scmp.ge.s32.totalorder %s3927_s26, 1  ;;  %p291_p6 = scmp.lt.s32.totalorder %s3927_s26, 3 }
  0x16   : > { %p292_p7 = pnand %p2794_p5, %p291_p6 }
  0x18   : > { %295 = sbr.rel (%p292_p7) target bundleno = 1157 (0x485), region = 85 }
  0x1d   : > { %v2855_v4 = vld [vmem:[%s6126_s1 + $0x70] sm:$0xf]  ;;  %v3678_v5 = vld [vmem:[%s6126_s1 + $0x74] sm:$0xf0]  ;;  %v2847_v15 = vld [vmem:[%s6126_s1 + $0x60] sm:$0xf] }
  0x1e   : > { %v2919_v6 = vld [vmem:[%s6126_s1 + $0xf0] sm:$0xf]  ;;  %v4014_v7 = vor.u32 %v3678_v5, %v2855_v4  ;;  %v3694_v8 = vld [vmem:[%s6126_s1 + $0xf4] sm:$0xf0]  ;;  %v3676_v17 = vld [vmem:[%s6126_s1 + $0x64] sm:$0xf0] }
  0x1f   : > { %v2983_v9 = vld [vmem:[%s6126_s1 + $0x170] sm:$0xf]  ;;  %v3710_v10 = vld [vmem:[%s6126_s1 + $0x174] sm:$0xf0]  ;;  %v4025_v11 = vor.u32 %v3694_v8, %v2919_v6  ;;  %v2911_v18 = vld [vmem:[%s6126_s1 + $0xe0] sm:$0xf]  ;;  %v4052_v20 = vor.u32 %v3676_v17, %v2847_v15 }
  0x20   : > { %v4027_v12 = vor.u32 %v3710_v10, %v2983_v9  ;;  %v3047_v13 = vld [vmem:[%s6126_s1 + $0x1f0] sm:$0xf]  ;;  %v3726_v14 = vld [vmem:[%s6126_s1 + $0x1f4] sm:$0xf0]  ;;  %831 = vmatpush.bf16.msra.mxu0 %v4014_v7  ;;  %v3692_v19 = vld [vmem:[%s6126_s1 + $0xe4] sm:$0xf0] }
  0x21   : > { %v4039_v16 = vor.u32 %v3726_v14, %v3047_v13  ;;  %844 = vmatpush.bf16.msra.mxu1 %v4025_v11  ;;  %v4054_v21 = vor.u32 %v3692_v19, %v2911_v18  ;;  %v2975_v22 = vld [vmem:[%s6126_s1 + $0x160] sm:$0xf]  ;;  %v3708_v23 = vld [vmem:[%s6126_s1 + $0x164] sm:$0xf0]  ;;  %v2839_v27 = vld [vmem:[%s6126_s1 + $0x50] sm:$0xf] }
  0x22   : > { %6269 = vst [vmem:[#allocation3_spill] sm:$0xff] %v4027_v12  ;;  %857 = vmatpush.bf16.msra.mxu2 %v4027_v12  ;;  %v3039_v24 = vld [vmem:[%s6126_s1 + $0x1e0] sm:$0xf]  ;;  %v4066_v25 = vor.u32 %v3708_v23, %v2975_v22  ;;  %v3724_v26 = vld [vmem:[%s6126_s1 + $0x1e4] sm:$0xf0]  ;;  %s298_s11 = sand.u32 1, %s3919_s24  }
  0x23   : > { %6270 = vst [vmem:[#allocation4_spill] sm:$0xff] %v4039_v16  ;;  %870 = vmatpush.bf16.msra.mxu3 %v4039_v16  ;;  %v3674_v28 = vld [vmem:[%s6126_s1 + $0x54] sm:$0xf0]  ;;  %v4077_v29 = vor.u32 %v3724_v26, %v3039_v24  ;;  %v2903_v30 = vld [vmem:[%s6126_s1 + $0xd0] sm:$0xf]  ;;  %s2795_s16 = sshll.u32 %s298_s11, 4 }
  0x24   : > { %6271 = vst [vmem:[#allocation5_spill] sm:$0xff] %v4066_v25  ;;  %v3690_v31 = vld [vmem:[%s6126_s1 + $0xd4] sm:$0xf0]  ;;  %v2967_v32 = vld [vmem:[%s6126_s1 + $0x150] sm:$0xf]  ;;  %832 = vmatpush.bf16.msra.mxu0 %v4052_v20  ;;  %v4089_v33 = vor.u32 %v3674_v28, %v2839_v27  ;;  %s300_s22 = scalar_lea.vmem [#allocation2], %s2795_s16 }
  0x25   : > { %6272 = vst [vmem:[#allocation6_spill] sm:$0xff] %v4077_v29  ;;  %v3706_v34 = vld [vmem:[%s6126_s1 + $0x154] sm:$0xf0]  ;;  %v3031_v35 = vld [vmem:[%s6126_s1 + $0x1d0] sm:$0xf]  ;;  %845 = vmatpush.bf16.msra.mxu1 %v4054_v21  ;;  %v4102_v37 = vor.u32 %v3690_v31, %v2903_v30  ;;  %p328_p8 = scmp.lt.s32.totalorder %s2788_s27, 1 }
  0x26   : > { %v3722_v36 = vld [vmem:[%s6126_s1 + $0x1d4] sm:$0xf0]  ;;  %858 = vmatpush.bf16.msra.mxu2 %v4066_v25  ;;  %v4104_v38 = vor.u32 %v3706_v34, %v2967_v32  ;;  %v2831_v39 = vld [vmem:[%s6126_s1 + $0x40] sm:$0xf]  ;;  %v3672_v40 = vld [vmem:[%s6126_s1 + $0x44] sm:$0xf0] }
  0x27   : > { %v2895_v41 = vld [vmem:[%s6126_s1 + $0xc0] sm:$0xf]  ;;  %871 = vmatpush.bf16.msra.mxu3 %v4077_v29  ;;  %v4116_v42 = vor.u32 %v3722_v36, %v3031_v35  ;;  %v3688_v43 = vld [vmem:[%s6126_s1 + $0xc4] sm:$0xf0]  ;;  %v4134_v48 = vor.u32 %v3672_v40, %v2831_v39  ;;  %v2823_v51 = vld [vmem:[%s6126_s1 + $0x30] sm:$0xf] }
  0x28   : > { %6273 = vst [vmem:[#allocation7_spill] sm:$0xff] %v4104_v38  ;;  %v2959_v44 = vld [vmem:[%s6126_s1 + $0x140] sm:$0xf]  ;;  %v3704_v45 = vld [vmem:[%s6126_s1 + $0x144] sm:$0xf0]  ;;  %833 = vmatpush.bf16.msra.mxu0 %v4089_v33  ;;  %v4138_v49 = vor.u32 %v3688_v43, %v2895_v41  ;;  %s6442_s27 = smov (!%p328_p8, %s2788_s27), 1 }
  0x29   : > { %6274 = vst [vmem:[#allocation8_spill] sm:$0xff] %v4116_v42  ;;  %v3023_v46 = vld [vmem:[%s6126_s1 + $0x1c0] sm:$0xf]  ;;  %v3720_v47 = vld [vmem:[%s6126_s1 + $0x1c4] sm:$0xf0]  ;;  %846 = vmatpush.bf16.msra.mxu1 %v4102_v37  ;;  %v4140_v50 = vor.u32 %v3704_v45, %v2959_v44  ;;  %s2796_s16 = sshll.u32 %s6442_s27, 3 }
  0x2a   : > { %6275 = vst [vmem:[#allocation9_spill] sm:$0xff] %v4134_v48  ;;  %859 = vmatpush.bf16.msra.mxu2 %v4104_v38  ;;  %v3670_v52 = vld [vmem:[%s6126_s1 + $0x34] sm:$0xf0]  ;;  %v2887_v53 = vld [vmem:[%s6126_s1 + $0xb0] sm:$0xf]  ;;  %v4152_v54 = vor.u32 %v3720_v47, %v3023_v46  ;;  %s331_s18 = scalar_lea.vmem %s6132_s7, %s2796_s16 }
  0x2b   : > { %6276 = vst [vmem:[#allocation10_spill] sm:$0xff] %v4138_v49  ;;  %872 = vmatpush.bf16.msra.mxu3 %v4116_v42  ;;  %v3686_v55 = vld [vmem:[%s6126_s1 + $0xb4] sm:$0xf0]  ;;  %v2951_v56 = vld [vmem:[%s6126_s1 + $0x130] sm:$0xf]  ;;  %v4170_v60 = vor.u32 %v3670_v52, %v2823_v51 }
  0x2c   : > { %6277 = vst [vmem:[#allocation11_spill] sm:$0xff] %v4140_v50  ;;  %v3702_v57 = vld [vmem:[%s6126_s1 + $0x134] sm:$0xf0]  ;;  %v3015_v58 = vld [vmem:[%s6126_s1 + $0x1b0] sm:$0xf]  ;;  %834 = vmatpush.bf16.msra.mxu0 %v4134_v48  ;;  %v4174_v61 = vor.u32 %v3686_v55, %v2887_v53 }
  0x2d   : > { %6278 = vst [vmem:[#allocation12_spill] sm:$0xff] %v4152_v54  ;;  %v3718_v59 = vld [vmem:[%s6126_s1 + $0x1b4] sm:$0xf0]  ;;  %847 = vmatpush.bf16.msra.mxu1 %v4138_v49  ;;  %v4176_v62 = vor.u32 %v3702_v57, %v2951_v56  ;;  %v2815_v63 = vld [vmem:[%s6126_s1 + $0x20] sm:$0xf] }
  0x2e   : > { %6279 = vst [vmem:[#allocation13_spill] sm:$0xff] %v4170_v60  ;;  %860 = vmatpush.bf16.msra.mxu2 %v4140_v50  ;;  %v3668_v0 = vld [vmem:[%s6126_s1 + $0x24] sm:$0xf0]  ;;  %v2879_v1 = vld [vmem:[%s6126_s1 + $0xa0] sm:$0xf]  ;;  %v4188_v2 = vor.u32 %v3718_v59, %v3015_v58 }
  0x2f   : > { %6280 = vst [vmem:[#allocation14_spill] sm:$0xff] %v4174_v61  ;;  %873 = vmatpush.bf16.msra.mxu3 %v4152_v54  ;;  %v3684_v3 = vld [vmem:[%s6126_s1 + $0xa4] sm:$0xf0]  ;;  %v2943_v4 = vld [vmem:[%s6126_s1 + $0x120] sm:$0xf]  ;;  %v4206_v9 = vor.u32 %v3668_v0, %v2815_v63 }
  0x30   : > { %v3700_v5 = vld [vmem:[%s6126_s1 + $0x124] sm:$0xf0]  ;;  %v3007_v6 = vld [vmem:[%s6126_s1 + $0x1a0] sm:$0xf]  ;;  %835 = vmatpush.bf16.msra.mxu0 %v4170_v60  ;;  %v4210_v10 = vor.u32 %v3684_v3, %v2879_v1  ;;  %v2807_v14 = vld [vmem:[%s6126_s1 + $0x10] sm:$0xf] }
  0x31   : > { %v3716_v8 = vld [vmem:[%s6126_s1 + $0x1a4] sm:$0xf0]  ;;  %848 = vmatpush.bf16.msra.mxu1 %v4174_v61  ;;  %v4212_v13 = vor.u32 %v3700_v5, %v2943_v4  ;;  %v3666_v15 = vld [vmem:[%s6126_s1 + $0x14] sm:$0xf0]  ;;  %v2871_v17 = vld [vmem:[%s6126_s1 + $0x90] sm:$0xf] }
  0x32   : > { %861 = vmatpush.bf16.msra.mxu2 %v4176_v62  ;;  %v4224_v18 = vor.u32 %v3716_v8, %v3007_v6  ;;  %v3682_v19 = vld [vmem:[%s6126_s1 + $0x94] sm:$0xf0]  ;;  %v2935_v22 = vld [vmem:[%s6126_s1 + $0x110] sm:$0xf]  ;;  %v4242_v27 = vor.u32 %v3666_v15, %v2807_v14  ;;  %v2799_v28 = vld [vmem:[%s6126_s1] sm:$0xf] }
  0x33   : > { %874 = vmatpush.bf16.msra.mxu3 %v4188_v2  ;;  %v3698_v23 = vld [vmem:[%s6126_s1 + $0x114] sm:$0xf0]  ;;  %v2999_v24 = vld [vmem:[%s6126_s1 + $0x190] sm:$0xf]  ;;  %v3664_v30 = vld [vmem:[%s6126_s1 + $0x4] sm:$0xf0]  ;;  %v4252_v31 = vor.u32 %v3682_v19, %v2871_v17 }
  0x34   : > { %v3714_v26 = vld [vmem:[%s6126_s1 + $0x194] sm:$0xf0]  ;;  %836 = vmatpush.bf16.msra.mxu0 %v4206_v9  ;;  %v4254_v32 = vor.u32 %v3698_v23, %v2935_v22  ;;  %v2863_v34 = vld [vmem:[%s6126_s1 + $0x80] sm:$0xf]  ;;  %v3680_v35 = vld [vmem:[%s6126_s1 + $0x84] sm:$0xf0]  ;;  %v4287_v47 = vor.u32 %v3664_v30, %v2799_v28 }
  0x35   : > { %849 = vmatpush.bf16.msra.mxu1 %v4210_v10  ;;  %v2927_v36 = vld [vmem:[%s6126_s1 + $0x100] sm:$0xf]  ;;  %v4266_v39 = vor.u32 %v3714_v26, %v2999_v24  ;;  %v3696_v40 = vld [vmem:[%s6126_s1 + $0x104] sm:$0xf0]  ;;  %v3111_v44 = vld [vmem:[%s6126_s1 + $0x270] sm:$0xf]  ;;  %v4300_v55 = vor.u32 %v3680_v35, %v2863_v34 }
  0x36   : > { %862 = vmatpush.bf16.msra.mxu2 %v4212_v13  ;;  %6281 = vst [vmem:[#allocation15_spill] sm:$0xff] %v4254_v32  ;;  %v2991_v41 = vld [vmem:[%s6126_s1 + $0x180] sm:$0xf]  ;;  %v3712_v43 = vld [vmem:[%s6126_s1 + $0x184] sm:$0xf0]  ;;  %v4302_v56 = vor.u32 %v3696_v40, %v2927_v36 }
  0x37   : > { %875 = vmatpush.bf16.msra.mxu3 %v4224_v18  ;;  %6282 = vst [vmem:[#allocation16_spill] sm:$0xff] %v4266_v39  ;;  %v3742_v45 = vld [vmem:[%s6126_s1 + $0x274] sm:$0xf0]  ;;  %v3677_v46 = vld [vmem:[%s6126_s1 + $0x74] sm:$0xf]  ;;  %v4311_v59 = vor.u32 %v3712_v43, %v2991_v41 }
  0x38   : > { %837 = vmatpush.bf16.msra.mxu0 %v4242_v27  ;;  %v2857_v51 = vld [vmem:[%s6126_s1 + $0x78] sm:$0xf0]  ;;  %v3693_v52 = vld [vmem:[%s6126_s1 + $0xf4] sm:$0xf]  ;;  %6283 = vst [vmem:[#allocation17_spill] sm:$0xff] %v4302_v56  ;;  %v4313_v63 = vor.u32 %v3742_v45, %v3111_v44 }
  0x39   : > { %v2921_v53 = vld [vmem:[%s6126_s1 + $0xf8] sm:$0xf0]  ;;  %850 = vmatpush.bf16.msra.mxu1 %v4252_v31  ;;  %v3709_v57 = vld [vmem:[%s6126_s1 + $0x174] sm:$0xf]  ;;  %6284 = vst [vmem:[#allocation18_spill] sm:$0xff] %v4311_v59  ;;  %v4315_v0 = vor.u32 %v3677_v46, %v2857_v51 }
  0x3a   : > { %863 = vmatpush.bf16.msra.mxu2 %v4254_v32  ;;  %v2985_v58 = vld [vmem:[%s6126_s1 + $0x178] sm:$0xf0]  ;;  %v4317_v1 = vor.u32 %v3693_v52, %v2921_v53  ;;  %v3103_v3 = vld [vmem:[%s6126_s1 + $0x260] sm:$0xf]  ;;  %v3740_v4 = vld [vmem:[%s6126_s1 + $0x264] sm:$0xf0] }
  0x3b   : > { %876 = vmatpush.bf16.msra.mxu3 %v4266_v39  ;;  %v3675_v5 = vld [vmem:[%s6126_s1 + $0x64] sm:$0xf]  ;;  %v4329_v6 = vor.u32 %v3709_v57, %v2985_v58  ;;  %v2849_v8 = vld [vmem:[%s6126_s1 + $0x68] sm:$0xf0]  ;;  %v4350_v22 = vor.u32 %v3740_v4, %v3103_v3  ;;  %v3095_v26 = vld [vmem:[%s6126_s1 + $0x250] sm:$0xf] }
  0x3c   : > { %6285 = vst [vmem:[#allocation19_spill] sm:$0xff] %v4317_v1  ;;  %838 = vmatpush.bf16.msra.mxu0 %v4287_v47  ;;  %v3691_v14 = vld [vmem:[%s6126_s1 + $0xe4] sm:$0xf]  ;;  %v2913_v15 = vld [vmem:[%s6126_s1 + $0xe8] sm:$0xf0]  ;;  %v4354_v23 = vor.u32 %v3675_v5, %v2849_v8 }
  0x3d   : > { %6286 = vst [vmem:[#allocation20_spill] sm:$0xff] %v4329_v6  ;;  %851 = vmatpush.bf16.msra.mxu1 %v4300_v55  ;;  %v3707_v17 = vld [vmem:[%s6126_s1 + $0x164] sm:$0xf]  ;;  %v2977_v19 = vld [vmem:[%s6126_s1 + $0x168] sm:$0xf0]  ;;  %v4356_v24 = vor.u32 %v3691_v14, %v2913_v15 }
  0x3e   : > { %864 = vmatpush.bf16.msra.mxu2 %v4302_v56  ;;  %6287 = vst [vmem:[#allocation21_spill] sm:$0xff] %v4350_v22  ;;  %v3738_v28 = vld [vmem:[%s6126_s1 + $0x254] sm:$0xf0]  ;;  %v3673_v30 = vld [vmem:[%s6126_s1 + $0x54] sm:$0xf]  ;;  %v4368_v34 = vor.u32 %v3707_v17, %v2977_v19 }
  0x3f   : > { %877 = vmatpush.bf16.msra.mxu3 %v4311_v59  ;;  %6288 = vst [vmem:[#allocation22_spill] sm:$0xff] %v4354_v23  ;;  %v2841_v35 = vld [vmem:[%s6126_s1 + $0x58] sm:$0xf0]  ;;  %v3689_v36 = vld [vmem:[%s6126_s1 + $0xd4] sm:$0xf]  ;;  %v4389_v45 = vor.u32 %v3738_v28, %v3095_v26 }
  0x40   : > { %883 = vmatpush.bf16.msrb.mxu0 %v4313_v63  ;;  %6289 = vst [vmem:[#allocation23_spill] sm:$0xff] %v4356_v24  ;;  %v2905_v40 = vld [vmem:[%s6126_s1 + $0xd8] sm:$0xf0]  ;;  %v3705_v41 = vld [vmem:[%s6126_s1 + $0x154] sm:$0xf]  ;;  %v4400_v52 = vor.u32 %v3673_v30, %v2841_v35 }
  0x41   : > { %896 = vmatpush.bf16.msrb.mxu1 %v4315_v0  ;;  %6290 = vst [vmem:[#allocation24_spill] sm:$0xff] %v4368_v34  ;;  %v2969_v43 = vld [vmem:[%s6126_s1 + $0x158] sm:$0xf0]  ;;  %v3087_v44 = vld [vmem:[%s6126_s1 + $0x240] sm:$0xf]  ;;  %v4402_v53 = vor.u32 %v3689_v36, %v2905_v40 }
  0x42   : > { %909 = vmatpush.bf16.msrb.mxu2 %v4317_v1  ;;  %6291 = vst [vmem:[#allocation25_spill] sm:$0xff] %v4389_v45  ;;  %v3736_v46 = vld [vmem:[%s6126_s1 + $0x244] sm:$0xf0]  ;;  %v3671_v51 = vld [vmem:[%s6126_s1 + $0x44] sm:$0xf]  ;;  %v4411_v3 = vor.u32 %v3705_v41, %v2969_v43 }
  0x43   : > { %922 = vmatpush.bf16.msrb.mxu3 %v4329_v6  ;;  %6292 = vst [vmem:[#allocation26_spill] sm:$0xff] %v4400_v52  ;;  %v2833_v57 = vld [vmem:[%s6126_s1 + $0x48] sm:$0xf0]  ;;  %v3687_v58 = vld [vmem:[%s6126_s1 + $0xc4] sm:$0xf]  ;;  %v4427_v17 = vor.u32 %v3736_v46, %v3087_v44 }
  0x44   : > { %884 = vmatpush.bf16.msrb.mxu0 %v4350_v22  ;;  %6293 = vst [vmem:[#allocation27_spill] sm:$0xff] %v4402_v53  ;;  %v2897_v4 = vld [vmem:[%s6126_s1 + $0xc8] sm:$0xf0]  ;;  %v3703_v5 = vld [vmem:[%s6126_s1 + $0x144] sm:$0xf]  ;;  %v4437_v28 = vor.u32 %v3671_v51, %v2833_v57 }
  0x45   : > { %897 = vmatpush.bf16.msrb.mxu1 %v4354_v23  ;;  %6294 = vst [vmem:[#allocation28_spill] sm:$0xff] %v4411_v3  ;;  %v2961_v8 = vld [vmem:[%s6126_s1 + $0x148] sm:$0xf0]  ;;  %v4422_v14 = vld [vmem:[%s300_s22 + $0x8] sm:$0xf]  ;;  %v4439_v30 = vor.u32 %v3687_v58, %v2897_v4 }
  0x46   : > { %910 = vmatpush.bf16.msrb.mxu2 %v4356_v24  ;;  %v4424_v15 = vld [vmem:[%s300_s22] sm:$0xf]  ;;  %6295 = vst [vmem:[#allocation29_spill] sm:$0xff] %v4427_v17  ;;  %v4433_v26 = vld [vmem:[%s300_s22 + $0xc] sm:$0xf]  ;;  %v4450_v41 = vor.u32 %v3703_v5, %v2961_v8 }
  0x47   : > { %923 = vmatpush.bf16.msrb.mxu3 %v4368_v34  ;;  %v3079_v19 = vld [vmem:[%s6126_s1 + $0x230] sm:$0xf]  ;;  %865 = vmatmul.bf16.vlgmr.msra.gmra.mxu2 %v4422_v14  ;;  %6296 = vst [vmem:[#allocation30_spill] sm:$0xff] %v4437_v28  ;;  %v3734_v35 = vld [vmem:[%s6126_s1 + $0x234] sm:$0xf0]  ;;  %v339_v4 = vunpack.c.l.b16 %v4424_v15 }
  0x48   : > { %885 = vmatpush.bf16.msrb.mxu0 %v4389_v45  ;;  %6297 = vst [vmem:[#allocation31_spill] sm:$0xff] %v4439_v30  ;;  %v3669_v36 = vld [vmem:[%s6126_s1 + $0x34] sm:$0xf]  ;;  %v2825_v43 = vld [vmem:[%s6126_s1 + $0x38] sm:$0xf0]  ;;  %878 = vmatmul.bf16.vlgmr.msra.gmra.mxu3 %v4433_v26  ;;  %v4471_v58 = vor.u32 %v3734_v35, %v3079_v19 }
  0x49   : > { %898 = vmatpush.bf16.msrb.mxu1 %v4400_v52  ;;  %v4447_v40 = vld [vmem:[%s300_s22 + $0x4] sm:$0xf]  ;;  %6298 = vst [vmem:[#allocation32_spill] sm:$0xff] %v4450_v41  ;;  %v2889_v46 = vld [vmem:[%s6126_s1 + $0xb8] sm:$0xf0]  ;;  %839 = vmatmul.bf16.vlgmr.msra.gmra.mxu0 %v4424_v15  ;;  %v4476_v5 = vor.u32 %v3669_v36, %v2825_v43 }
  0x4a   : > { %911 = vmatpush.bf16.msrb.mxu2 %v4402_v53  ;;  %v3685_v44 = vld [vmem:[%s6126_s1 + $0xb4] sm:$0xf]  ;;  %v2953_v57 = vld [vmem:[%s6126_s1 + $0x138] sm:$0xf0]  ;;  %852 = vmatmul.bf16.vlgmr.msra.gmra.mxu1 %v4447_v40  ;;  %6299 = vst [vmem:[#allocation33_spill] sm:$0xff] %v4471_v58 }
  0x4b   : > { %924 = vmatpush.bf16.msrb.mxu3 %v4411_v3  ;;  %v3701_v51 = vld [vmem:[%s6126_s1 + $0x134] sm:$0xf]  ;;  %6300 = vst [vmem:[#allocation34_spill] sm:$0xff] %v4476_v5  ;;  %v4478_v8 = vor.u32 %v3685_v44, %v2889_v46  ;;  %v3071_v3 = vld [vmem:[%s6126_s1 + $0x220] sm:$0xf] }
  0x4c   : > { %886 = vmatpush.bf16.msrb.mxu0 %v4427_v17  ;;  %v3732_v53 = vld [vmem:[%s6126_s1 + $0x224] sm:$0xf0]  ;;  %v3667_v19 = vld [vmem:[%s6126_s1 + $0x24] sm:$0xf]  ;;  %v4490_v35 = vor.u32 %v3701_v51, %v2953_v57  ;;  %v2817_v36 = vld [vmem:[%s6126_s1 + $0x28] sm:$0xf0] }
  0x4d   : > { %899 = vmatpush.bf16.msrb.mxu1 %v4437_v28  ;;  %6301 = vst [vmem:[#allocation35_spill] sm:$0xff] %v4478_v8  ;;  %v3683_v43 = vld [vmem:[%s6126_s1 + $0xa4] sm:$0xf]  ;;  %v2881_v44 = vld [vmem:[%s6126_s1 + $0xa8] sm:$0xf0]  ;;  %v4508_v57 = vor.u32 %v3732_v53, %v3071_v3 }
  0x4e   : > { %912 = vmatpush.bf16.msrb.mxu2 %v4439_v30  ;;  %6302 = vst [vmem:[#allocation36_spill] sm:$0xff] %v4490_v35  ;;  %v3699_v46 = vld [vmem:[%s6126_s1 + $0x124] sm:$0xf]  ;;  %v2945_v51 = vld [vmem:[%s6126_s1 + $0x128] sm:$0xf0]  ;;  %v4512_v30 = vor.u32 %v3667_v19, %v2817_v36  ;;  %v4514_v34 = vor.u32 %v3683_v43, %v2881_v44 }
  0x4f   : > { %925 = vmatpush.bf16.msrb.mxu3 %v4450_v41  ;;  %6303 = vst [vmem:[#allocation37_spill] sm:$0xff] %v4508_v57  ;;  %v340_v41 = vpack.c.b16 %v339_v4, %v339_v4  ;;  %v3063_v24 = vld [vmem:[%s6126_s1 + $0x210] sm:$0xf]  ;;  %v3730_v6 = vld [vmem:[%s6126_s1 + $0x214] sm:$0xf0]  ;;  %v4526_v3 = vor.u32 %v3699_v46, %v2945_v51 }
  0x50   : > { %887 = vmatpush.bf16.msrb.mxu0 %v4471_v58  ;;  %6304 = vst [vmem:[#allocation38_spill] sm:$0xff] %v4512_v30  ;;  %v3665_v53 = vld [vmem:[%s6126_s1 + $0x14] sm:$0xf]  ;;  %v2809_v4 = vld [vmem:[%s6126_s1 + $0x18] sm:$0xf0]  ;;  %v4544_v51 = vor.u32 %v3730_v6, %v3063_v24 }
  0x51   : > { %900 = vmatpush.bf16.msrb.mxu1 %v4476_v5  ;;  %6305 = vst [vmem:[#allocation39_spill] sm:$0xff] %v4514_v34  ;;  %v3681_v19 = vld [vmem:[%s6126_s1 + $0x94] sm:$0xf]  ;;  %v2873_v36 = vld [vmem:[%s6126_s1 + $0x98] sm:$0xf0]  ;;  %v344_v46 = vshll.u32 %v340_v41, 16 }
  0x52   : > { %913 = vmatpush.bf16.msrb.mxu2 %v4478_v8  ;;  %6306 = vst [vmem:[#allocation40_spill] sm:$0xff] %v4526_v3  ;;  %v3697_v43 = vld [vmem:[%s6126_s1 + $0x114] sm:$0xf]  ;;  %v2937_v44 = vld [vmem:[%s6126_s1 + $0x118] sm:$0xf0]  ;;  %v4551_v8 = vor.u32 %v3665_v53, %v2809_v4  ;;  %v4553_v1 = vor.u32 %v3681_v19, %v2873_v36 }
  0x53   : > { %926 = vmatpush.bf16.msrb.mxu3 %v4490_v35  ;;  %6307 = vst [vmem:[#allocation41_spill] sm:$0xff] %v4544_v51  ;;  %v3055_v35 = vld [vmem:[%s6126_s1 + $0x200] sm:$0xf]  ;;  %v3728_v59 = vld [vmem:[%s6126_s1 + $0x204] sm:$0xf0]  ;;  %v4565_v56 = vor.u32 %v3697_v43, %v2937_v44 }
  0x54   : > { %888 = vmatpush.bf16.msrb.mxu0 %v4508_v57  ;;  %6308 = vst [vmem:[#allocation42_spill] sm:$0xff] %v4553_v1  ;;  %v3663_v6 = vld [vmem:[%s6126_s1 + $0x4] sm:$0xf]  ;;  %v2801_v24 = vld [vmem:[%s6126_s1 + $0x8] sm:$0xf0]  ;;  %v4586_v39 = vor.u32 %v3728_v59, %v3055_v35 }
  0x55   : > { %901 = vmatpush.bf16.msrb.mxu1 %v4512_v30  ;;  %6309 = vst [vmem:[#allocation43_spill] sm:$0xff] %v4565_v56  ;;  %v3679_v53 = vld [vmem:[%s6126_s1 + $0x84] sm:$0xf]  ;;  %v2865_v4 = vld [vmem:[%s6126_s1 + $0x88] sm:$0xf0]  ;;  %v4596_v57 = vor.u32 %v3663_v6, %v2801_v24 }
  0x56   : > { %914 = vmatpush.bf16.msrb.mxu2 %v4514_v34  ;;  %v3695_v19 = vld [vmem:[%s6126_s1 + $0x104] sm:$0xf]  ;;  %v2929_v36 = vld [vmem:[%s6126_s1 + $0x108] sm:$0xf0]  ;;  %v3725_v43 = vld [vmem:[%s6126_s1 + $0x1f4] sm:$0xf] }
  0x57   : > { %927 = vmatpush.bf16.msrb.mxu3 %v4526_v3  ;;  %v3049_v44 = vld [vmem:[%s6126_s1 + $0x1f8] sm:$0xf0]  ;;  %v342_v3 = vshrl.u32 %v340_v41, 16  ;;  %v346_v34 = vrot.slane %v344_v46, 1  ;;  %6310 = vst [vmem:[#allocation44_spill] sm:$0xff] %v4586_v39  ;;  %v4598_v41 = vor.u32 %v3679_v53, %v2865_v4  ;;  %v4601_v59 = vor.u32 %v3695_v19, %v2929_v36 }
  0x58   : > { %889 = vmatpush.bf16.msrb.mxu0 %v4544_v51  ;;  %v3741_v32 = vld [vmem:[%s6126_s1 + $0x274] sm:$0xf]  ;;  %v3113_v30 = vld [vmem:[%s6126_s1 + $0x278] sm:$0xf0]  ;;  %6311 = vst [vmem:[#allocation45_spill] sm:$0xff] %v4596_v57  ;;  %v4603_v35 = vor.u32 %v3725_v43, %v3049_v44 }
  0x59   : > { %902 = vmatpush.bf16.msrb.mxu1 %v4551_v8  ;;  %6312 = vst [vmem:[#allocation46_spill] sm:$0xff] %v4598_v41  ;;  %v4605_v46 = vor.u32 %v3741_v32, %v3113_v30  ;;  %v3723_v51 = vld [vmem:[%s6126_s1 + $0x1e4] sm:$0xf]  ;;  %v4613_v6 = vor.u32 %v346_v34, %v342_v3  ;;  %v3105_v32 = vld [vmem:[%s6126_s1 + $0x268] sm:$0xf0] }
  0x5a   : > { %915 = vmatpush.bf16.msrb.mxu2 %v4553_v1  ;;  %6313 = vst [vmem:[#allocation47_spill] sm:$0xff] %v4601_v59  ;;  %v3041_v1 = vld [vmem:[%s6126_s1 + $0x1e8] sm:$0xf0]  ;;  %v3739_v24 = vld [vmem:[%s6126_s1 + $0x264] sm:$0xf] }
  0x5b   : > { %928 = vmatpush.bf16.msrb.mxu3 %v4565_v56  ;;  %6314 = vst [vmem:[#allocation48_spill] sm:$0xff] %v4603_v35  ;;  %v4626_v34 = vor.u32 %v3723_v51, %v3041_v1  ;;  %v4630_v30 = vor.u32 %v3739_v24, %v3105_v32  ;;  %v3721_v3 = vld [vmem:[%s6126_s1 + $0x1d4] sm:$0xf]  ;;  %v3033_v53 = vld [vmem:[%s6126_s1 + $0x1d8] sm:$0xf0] }
  0x5c   : > { %6315 = vst [vmem:[#allocation49_spill] sm:$0xff] %v4605_v46  ;;  %890 = vmatpush.bf16.msrb.mxu0 %v4586_v39  ;;  %v3737_v1 = vld [vmem:[%s6126_s1 + $0x254] sm:$0xf]  ;;  %v3097_v51 = vld [vmem:[%s6126_s1 + $0x258] sm:$0xf0]  ;;  %v4649_v4 = vor.u32 %v3721_v3, %v3033_v53 }
  0x5d   : > { %903 = vmatpush.bf16.msrb.mxu1 %v4596_v57  ;;  %6316 = vst [vmem:[#allocation50_spill] sm:$0xff] %v4626_v34  ;;  %v4654_v19 = vor.u32 %v3737_v1, %v3097_v51  ;;  %v3719_v36 = vld [vmem:[%s6126_s1 + $0x1c4] sm:$0xf]  ;;  %v3089_v44 = vld [vmem:[%s6126_s1 + $0x248] sm:$0xf0] }
  0x5e   : > { %916 = vmatpush.bf16.msrb.mxu2 %v4598_v41  ;;  %6317 = vst [vmem:[#allocation51_spill] sm:$0xff] %v4630_v30  ;;  %v3735_v43 = vld [vmem:[%s6126_s1 + $0x244] sm:$0xf]  ;;  %v3717_v3 = vld [vmem:[%s6126_s1 + $0x1b4] sm:$0xf] }
  0x5f   : > { %929 = vmatpush.bf16.msrb.mxu3 %v4601_v59  ;;  %891 = vmatmul.bf16.vlgmr.msrb.gmra.mxu0 %v4613_v6  ;;  %6318 = vst [vmem:[#allocation52_spill] sm:$0xff] %v4649_v4  ;;  %v4674_v32 = vor.u32 %v3735_v43, %v3089_v44  ;;  %v3017_v53 = vld [vmem:[%s6126_s1 + $0x1b8] sm:$0xf0]  ;;  %v3733_v1 = vld [vmem:[%s6126_s1 + $0x234] sm:$0xf] }
  0x60   : > { %935 = vmatpush.bf16.msra.mxu0 %v4603_v35  ;;  %904 = vmatmul.bf16.vlgmr.msrb.gmra.mxu1 %v4424_v15  ;;  %6319 = vst [vmem:[#allocation53_spill] sm:$0xff] %v4654_v19  ;;  %v3025_v15 = vld [vmem:[%s6126_s1 + $0x1c8] sm:$0xf0]  ;;  %v3081_v51 = vld [vmem:[%s6126_s1 + $0x238] sm:$0xf0] }
  0x61   : > { %948 = vmatpush.bf16.msra.mxu1 %v4605_v46  ;;  %917 = vmatmul.bf16.vlgmr.msrb.gmra.mxu2 %v4447_v40  ;;  %v4670_v24 = vor.u32 %v3719_v36, %v3025_v15  ;;  %v4690_v36 = vor.u32 %v3717_v3, %v3017_v53  ;;  %v4694_v15 = vor.u32 %v3733_v1, %v3081_v51  ;;  %v3715_v43 = vld [vmem:[%s6126_s1 + $0x1a4] sm:$0xf]  ;;  %v3009_v44 = vld [vmem:[%s6126_s1 + $0x1a8] sm:$0xf0] }
  0x62   : > { %975 = vmatpush.bf16.msra.mxu2 %v4014_v7  ;;  %930 = vmatmul.bf16.vlgmr.msrb.gmra.mxu3 %v4422_v14  ;;  %v3731_v3 = vld [vmem:[%s6126_s1 + $0x224] sm:$0xf]  ;;  %v3073_v53 = vld [vmem:[%s6126_s1 + $0x228] sm:$0xf0]  ;;  %v4710_v1 = vor.u32 %v3715_v43, %v3009_v44  ;;  %v3729_v43 = vld [vmem:[%s6126_s1 + $0x214] sm:$0xf] }
  0x63   : > { %988 = vmatpush.bf16.msra.mxu3 %v4025_v11  ;;  %v4714_v51 = vor.u32 %v3731_v3, %v3073_v53  ;;  %v3065_v44 = vld [vmem:[%s6126_s1 + $0x218] sm:$0xf0] }
  0x64   : > { %936 = vmatpush.bf16.msra.mxu0 %v4626_v34  ;;  %6320 = vst [vmem:[#allocation54_spill] sm:$0xff] %v4710_v1  ;;  %v4734_v53 = vor.u32 %v3729_v43, %v3065_v44 }
  0x65   : > { %949 = vmatpush.bf16.msra.mxu1 %v4630_v30  ;;  %6321 = vst [vmem:[#allocation55_spill] sm:$0xff] %v4714_v51 }
  0x66   : > { %976 = vmatpush.bf16.msra.mxu2 %v4052_v20  ;;  %6323 = vst [vmem:[#allocation57_spill] sm:$0xff] %v4734_v53 }
  0x67   : > { %989 = vmatpush.bf16.msra.mxu3 %v4054_v21 }
  0x68   : > { %937 = vmatpush.bf16.msra.mxu0 %v4649_v4 }
  0x69   : > { %950 = vmatpush.bf16.msra.mxu1 %v4654_v19 }
  0x6a   : > { %977 = vmatpush.bf16.msra.mxu2 %v4089_v33 }
  0x6b   : > { %990 = vmatpush.bf16.msra.mxu3 %v4102_v37 }
  0x6c   : > { %938 = vmatpush.bf16.msra.mxu0 %v4670_v24 }
  0x6d   : > { %951 = vmatpush.bf16.msra.mxu1 %v4674_v32 }
  0x6e   : > { %978 = vmatpush.bf16.msra.mxu2 %v4134_v48  ;;  %v3001_v48 = vld [vmem:[%s6126_s1 + $0x198] sm:$0xf0] }
  0x6f   : > { %991 = vmatpush.bf16.msra.mxu3 %v4138_v49  ;;  %v3713_v49 = vld [vmem:[%s6126_s1 + $0x194] sm:$0xf] }
  0x70   : > { %939 = vmatpush.bf16.msra.mxu0 %v4690_v36  ;;  %v4730_v3 = vor.u32 %v3713_v49, %v3001_v48  ;;  %v3727_v48 = vld [vmem:[%s6126_s1 + $0x204] sm:$0xf]  ;;  %v3057_v49 = vld [vmem:[%s6126_s1 + $0x208] sm:$0xf0] }
  0x71   : > { %952 = vmatpush.bf16.msra.mxu1 %v4694_v15  ;;  %v4754_v44 = vor.u32 %v3727_v48, %v3057_v49  ;;  %v6326_v49 = vld [vmem:[#allocation37_spill] sm:$0xff] }
  0x72   : > { %979 = vmatpush.bf16.msra.mxu2 %v4170_v60  ;;  %6322 = vst [vmem:[#allocation56_spill] sm:$0xff] %v4730_v3  ;;  %v2993_v60 = vld [vmem:[%s6126_s1 + $0x188] sm:$0xf0] }
  0x73   : > { %992 = vmatpush.bf16.msra.mxu3 %v4174_v61  ;;  %v3711_v61 = vld [vmem:[%s6126_s1 + $0x184] sm:$0xf]  ;;  %6325 = vst [vmem:[#allocation59_spill] sm:$0xff] %v4754_v44 }
  0x74   : > { %940 = vmatpush.bf16.msra.mxu0 %v4710_v1  ;;  %v4750_v43 = vor.u32 %v3711_v61, %v2993_v60  ;;  %v965_v60 = vunpack.c.l.b16 %v4447_v40 }
  0x75   : > { %953 = vmatpush.bf16.msra.mxu1 %v4714_v51 }
  0x76   : > { %980 = vmatpush.bf16.msra.mxu2 %v4206_v9  ;;  %6324 = vst [vmem:[#allocation58_spill] sm:$0xff] %v4750_v43  ;;  %v966_v61 = vpack.c.b16 %v965_v60, %v965_v60  ;;  %v6328_v60 = vld [vmem:[#allocation15_spill] sm:$0xff] }
  0x77   : > { %993 = vmatpush.bf16.msra.mxu3 %v4210_v10 }
  0x78   : > { %941 = vmatpush.bf16.msra.mxu0 %v4730_v3  ;;  %v970_v48 = vshll.u32 %v966_v61, 16 }
  0x79   : > { %954 = vmatpush.bf16.msra.mxu1 %v4734_v53 }
  0x7a   : > { %981 = vmatpush.bf16.msra.mxu2 %v4242_v27 }
  0x7b   : > { %994 = vmatpush.bf16.msra.mxu3 %v4252_v31 }
  0x7c   : > { %942 = vmatpush.bf16.msra.mxu0 %v4750_v43 }
  0x7d   : > { %955 = vmatpush.bf16.msra.mxu1 %v4754_v44 }
  0x7e   : > { %982 = vmatpush.bf16.msra.mxu2 %v4287_v47 }
  0x7f   : > { %995 = vmatpush.bf16.msra.mxu3 %v4300_v55  ;;  %943 = vmatmul.bf16.vlgmr.msra.gmra.mxu0 %v4433_v26 }
  0x80   : > { %1001 = vmatpush.bf16.msrb.mxu0 %v4027_v12  ;;  %956 = vmatmul.bf16.vlgmr.msra.gmra.mxu1 %v4613_v6 }
  0x81   : > { %1014 = vmatpush.bf16.msrb.mxu1 %v4039_v16  ;;  %983 = vmatmul.bf16.vlgmr.msra.gmra.mxu2 %v4447_v40 }
  0x82   : > { %1027 = vmatpush.bf16.msrb.mxu2 %v4313_v63  ;;  %996 = vmatmul.bf16.vlgmr.msra.gmra.mxu3 %v4422_v14 }
  0x83   : > { %1040 = vmatpush.bf16.msrb.mxu3 %v4315_v0 }
  0x84   : > { %1002 = vmatpush.bf16.msrb.mxu0 %v4066_v25 }
  0x85   : > { %1015 = vmatpush.bf16.msrb.mxu1 %v4077_v29 }
  0x86   : > { %1028 = vmatpush.bf16.msrb.mxu2 %v4350_v22  ;;  %v6332_v22 = vld [vmem:[#allocation18_spill] sm:$0xff] }
  0x87   : > { %1041 = vmatpush.bf16.msrb.mxu3 %v4354_v23  ;;  %v6330_v23 = vld [vmem:[#allocation41_spill] sm:$0xff] }
  0x88   : > { %1003 = vmatpush.bf16.msrb.mxu0 %v4104_v38 }
  0x89   : > { %1016 = vmatpush.bf16.msrb.mxu1 %v4116_v42 }
  0x8a   : > { %1029 = vmatpush.bf16.msrb.mxu2 %v4389_v45  ;;  %v6329_v45 = vld [vmem:[#allocation16_spill] sm:$0xff] }
  0x8b   : > { %1042 = vmatpush.bf16.msrb.mxu3 %v4400_v52  ;;  %v6327_v52 = vld [vmem:[#allocation38_spill] sm:$0xff] }
  0x8c   : > { %1004 = vmatpush.bf16.msrb.mxu0 %v4140_v50 }
  0x8d   : > { %1017 = vmatpush.bf16.msrb.mxu1 %v4152_v54 }
  0x8e   : > { %1030 = vmatpush.bf16.msrb.mxu2 %v4427_v17  ;;  %v968_v17 = vshrl.u32 %v966_v61, 16  ;;  %v6333_v61 = vld [vmem:[#allocation19_spill] sm:$0xff] }
  0x8f   : > { %1043 = vmatpush.bf16.msrb.mxu3 %v4437_v28  ;;  %v972_v28 = vrot.slane %v970_v48, 1  ;;  %v6334_v48 = vld [vmem:[#allocation20_spill] sm:$0xff] }
  0x90   : > { %1005 = vmatpush.bf16.msrb.mxu0 %v4176_v62 }
  0x91   : > { %1018 = vmatpush.bf16.msrb.mxu1 %v4188_v2 }
  0x92   : > { %1031 = vmatpush.bf16.msrb.mxu2 %v4471_v58  ;;  %v6331_v58 = vld [vmem:[#allocation17_spill] sm:$0xff] }
  0x93   : > { %1044 = vmatpush.bf16.msrb.mxu3 %v4476_v5  ;;  %v4794_v5 = vor.u32 %v972_v28, %v968_v17  ;;  %v6335_v17 = vld [vmem:[#allocation23_spill] sm:$0xff]  ;;  %v6336_v28 = vld [vmem:[#allocation24_spill] sm:$0xff] }
  0x94   : > { %1006 = vmatpush.bf16.msrb.mxu0 %v4212_v13 }
  0x95   : > { %1019 = vmatpush.bf16.msrb.mxu1 %v4224_v18 }
  0x96   : > { %1032 = vmatpush.bf16.msrb.mxu2 %v6326_v49 }
  0x97   : > { %1045 = vmatpush.bf16.msrb.mxu3 %v6327_v52 }
  0x98   : > { %1007 = vmatpush.bf16.msrb.mxu0 %v6328_v60 }
  0x99   : > { %1020 = vmatpush.bf16.msrb.mxu1 %v6329_v45 }
  0x9a   : > { %1033 = vmatpush.bf16.msrb.mxu2 %v6330_v23 }
  0x9b   : > { %1046 = vmatpush.bf16.msrb.mxu3 %v4551_v8 }
  0x9c   : > { %1008 = vmatpush.bf16.msrb.mxu0 %v6331_v58 }
  0x9d   : > { %1021 = vmatpush.bf16.msrb.mxu1 %v6332_v22 }
  0x9e   : > { %1034 = vmatpush.bf16.msrb.mxu2 %v4586_v39  ;;  %v6340_v39 = vld [vmem:[#allocation32_spill] sm:$0xff] }
  0x9f   : > { %1047 = vmatpush.bf16.msrb.mxu3 %v4596_v57  ;;  %1009 = vmatmul.bf16.vlgmr.msrb.gmra.mxu0 %v4433_v26  ;;  %v6337_v57 = vld [vmem:[#allocation27_spill] sm:$0xff] }
  0xa0   : > { %1053 = vmatpush.bf16.msra.mxu0 %v6333_v61  ;;  %1022 = vmatmul.bf16.vlgmr.msrb.gmra.mxu1 %v4613_v6 }
  0xa1   : > { %1066 = vmatpush.bf16.msra.mxu1 %v6334_v48  ;;  %1035 = vmatmul.bf16.vlgmr.msrb.gmra.mxu2 %v4794_v5 }
  0xa2   : > { %1079 = vmatpush.bf16.msra.mxu2 %v4603_v35  ;;  %1048 = vmatmul.bf16.vlgmr.msrb.gmra.mxu3 %v4447_v40  ;;  %v6338_v35 = vld [vmem:[#allocation28_spill] sm:$0xff]  ;;  %v6341_v40 = vld [vmem:[#allocation35_spill] sm:$0xff] }
  0xa3   : > { %1092 = vmatpush.bf16.msra.mxu3 %v4605_v46  ;;  %v6339_v46 = vld [vmem:[#allocation31_spill] sm:$0xff] }
  0xa4   : > { %1054 = vmatpush.bf16.msra.mxu0 %v6335_v17 }
  0xa5   : > { %1067 = vmatpush.bf16.msra.mxu1 %v6336_v28 }
  0xa6   : > { %1080 = vmatpush.bf16.msra.mxu2 %v4626_v34  ;;  %v6342_v34 = vld [vmem:[#allocation36_spill] sm:$0xff] }
  0xa7   : > { %1093 = vmatpush.bf16.msra.mxu3 %v4630_v30  ;;  %v6343_v30 = vld [vmem:[#allocation39_spill] sm:$0xff] }
  0xa8   : > { %1055 = vmatpush.bf16.msra.mxu0 %v6337_v57 }
  0xa9   : > { %1068 = vmatpush.bf16.msra.mxu1 %v6338_v35 }
  0xaa   : > { %1081 = vmatpush.bf16.msra.mxu2 %v4649_v4  ;;  %v6344_v4 = vld [vmem:[#allocation40_spill] sm:$0xff] }
  0xab   : > { %1094 = vmatpush.bf16.msra.mxu3 %v4654_v19  ;;  %v6345_v19 = vld [vmem:[#allocation42_spill] sm:$0xff] }
  0xac   : > { %1056 = vmatpush.bf16.msra.mxu0 %v6339_v46 }
  0xad   : > { %1069 = vmatpush.bf16.msra.mxu1 %v6340_v39 }
  0xae   : > { %1082 = vmatpush.bf16.msra.mxu2 %v4670_v24 }
  0xaf   : > { %1095 = vmatpush.bf16.msra.mxu3 %v4674_v32 }
  0xb0   : > { %1057 = vmatpush.bf16.msra.mxu0 %v6341_v40 }
  0xb1   : > { %1070 = vmatpush.bf16.msra.mxu1 %v6342_v34 }
  0xb2   : > { %1083 = vmatpush.bf16.msra.mxu2 %v4690_v36 }
  0xb3   : > { %1096 = vmatpush.bf16.msra.mxu3 %v4694_v15 }
  0xb4   : > { %1058 = vmatpush.bf16.msra.mxu0 %v6343_v30 }
  0xb5   : > { %1071 = vmatpush.bf16.msra.mxu1 %v6344_v4 }
  0xb6   : > { %1084 = vmatpush.bf16.msra.mxu2 %v4710_v1 }
  0xb7   : > { %1097 = vmatpush.bf16.msra.mxu3 %v4714_v51 }
  0xb8   : > { %1059 = vmatpush.bf16.msra.mxu0 %v6345_v19 }
  0xb9   : > { %1072 = vmatpush.bf16.msra.mxu1 %v4565_v56 }
  0xba   : > { %1085 = vmatpush.bf16.msra.mxu2 %v4730_v3  ;;  %v6349_v3 = vld [vmem:[#allocation14_spill] sm:$0xff] }
  0xbb   : > { %1098 = vmatpush.bf16.msra.mxu3 %v4734_v53 }
  0xbc   : > { %1060 = vmatpush.bf16.msra.mxu0 %v4598_v41 }
  0xbd   : > { %1073 = vmatpush.bf16.msra.mxu1 %v4601_v59 }
  0xbe   : > { %1086 = vmatpush.bf16.msra.mxu2 %v4750_v43  ;;  %v6347_v43 = vld [vmem:[#allocation10_spill] sm:$0xff] }
  0xbf   : > { %1099 = vmatpush.bf16.msra.mxu3 %v4754_v44  ;;  %1061 = vmatmul.bf16.vlgmr.msra.gmra.mxu0 %v4422_v14 }
  0xc0   : > { %1120 = vmatpush.bf16.msrb.mxu0 %v4014_v7  ;;  %1074 = vmatmul.bf16.vlgmr.msra.gmra.mxu1 %v4433_v26 }
  0xc1   : > { %1133 = vmatpush.bf16.msrb.mxu1 %v4025_v11  ;;  %1087 = vmatmul.bf16.vlgmr.msra.gmra.mxu2 %v4613_v6 }
  0xc2   : > { %1146 = vmatpush.bf16.msrb.mxu2 %v4027_v12  ;;  %1100 = vmatmul.bf16.vlgmr.msra.gmra.mxu3 %v4794_v5  ;;  %v6346_v12 = vld [vmem:[#allocation9_spill] sm:$0xff] }
  0xc3   : > { %1159 = vmatpush.bf16.msrb.mxu3 %v4039_v16  ;;  %v336_v16 = vld [vmem:[%s6131_s6] sm:$0xff] }
  0xc4   : > { %1121 = vmatpush.bf16.msrb.mxu0 %v4052_v20  ;;  %v4856_v44 = vperm.slane %v336_v16, 0 }
  0xc5   : > { %1134 = vmatpush.bf16.msrb.mxu1 %v4054_v21 }
  0xc6   : > { %1147 = vmatpush.bf16.msrb.mxu2 %v4066_v25  ;;  %v6348_v25 = vld [vmem:[#allocation13_spill] sm:$0xff] }
  0xc7   : > { %1160 = vmatpush.bf16.msrb.mxu3 %v4077_v29  ;;  %v840_v29 = vpop.f32.mrf.mxu0  ;;  %v853_v53 = vpop.f32.mrf.mxu1 }
  0xc8   : > { %1122 = vmatpush.bf16.msrb.mxu0 %v4089_v33 }
  0xc9   : > { %1135 = vmatpush.bf16.msrb.mxu1 %v4102_v37 }
  0xca   : > { %1148 = vmatpush.bf16.msrb.mxu2 %v4104_v38  ;;  %v841_v38 = vadd.f32 %v840_v29, %v4856_v44 }
  0xcb   : > { %1161 = vmatpush.bf16.msrb.mxu3 %v4116_v42  ;;  %v866_v42 = vpop.f32.mrf.mxu2 }
  0xcc   : > { %1123 = vmatpush.bf16.msrb.mxu0 %v6346_v12  ;;  %v854_v16 = vadd.f32 %v853_v53, %v841_v38 }
  0xcd   : > { %1136 = vmatpush.bf16.msrb.mxu1 %v6347_v43 }
  0xce   : > { %1149 = vmatpush.bf16.msrb.mxu2 %v4140_v50  ;;  %v867_v51 = vadd.f32 %v866_v42, %v854_v16  ;;  %v6352_v16 = vld [vmem:[#allocation25_spill] sm:$0xff] }
  0xcf   : > { %1162 = vmatpush.bf16.msrb.mxu3 %v4152_v54  ;;  %v879_v54 = vpop.f32.mrf.mxu3  ;;  %v842_v50 = vpop.f32.mrf.mxu0 }
  0xd0   : > { %1124 = vmatpush.bf16.msrb.mxu0 %v6348_v25  ;;  %v880_v29 = vadd.f32 %v879_v54, %v867_v51  ;;  %v855_v1 = vpop.f32.mrf.mxu1  ;;  %v6350_v50 = vld [vmem:[#allocation21_spill] sm:$0xff]  ;;  %v337_v54 = vld [vmem:[%s6131_s6 + $0x8] sm:$0xff] }
  0xd1   : > { %1137 = vmatpush.bf16.msrb.mxu1 %v6349_v3  ;;  %v6351_v1 = vld [vmem:[#allocation22_spill] sm:$0xff]  ;;  %v4893_v53 = vperm.slane %v337_v54, 0 }
  0xd2   : > { %1150 = vmatpush.bf16.msrb.mxu2 %v4176_v62 }
  0xd3   : > { %1163 = vmatpush.bf16.msrb.mxu3 %v4188_v2  ;;  %v868_v38 = vpop.f32.mrf.mxu2 }
  0xd4   : > { %1125 = vmatpush.bf16.msrb.mxu0 %v4206_v9 }
  0xd5   : > { %1138 = vmatpush.bf16.msrb.mxu1 %v4210_v10 }
  0xd6   : > { %1151 = vmatpush.bf16.msrb.mxu2 %v4212_v13 }
  0xd7   : > { %1164 = vmatpush.bf16.msrb.mxu3 %v4224_v18  ;;  %v881_v42 = vpop.f32.mrf.mxu3 }
  0xd8   : > { %1126 = vmatpush.bf16.msrb.mxu0 %v4242_v27 }
  0xd9   : > { %1139 = vmatpush.bf16.msrb.mxu1 %v4252_v31 }
  0xda   : > { %1152 = vmatpush.bf16.msrb.mxu2 %v6328_v60  ;;  %v6357_v60 = vld [vmem:[#allocation34_spill] sm:$0xff] }
  0xdb   : > { %1165 = vmatpush.bf16.msrb.mxu3 %v6329_v45  ;;  %v6356_v45 = vld [vmem:[#allocation33_spill] sm:$0xff] }
  0xdc   : > { %1127 = vmatpush.bf16.msrb.mxu0 %v4287_v47  ;;  %v892_v51 = vpop.f32.mrf.mxu0 }
  0xdd   : > { %1140 = vmatpush.bf16.msrb.mxu1 %v4300_v55  ;;  %v4896_v38 = vadd.f32 %v892_v51, %v880_v29  ;;  %v905_v42 = vpop.f32.mrf.mxu1 }
  0xde   : > { %1153 = vmatpush.bf16.msrb.mxu2 %v6331_v58 }
  0xdf   : > { %1166 = vmatpush.bf16.msrb.mxu3 %v6332_v22  ;;  %1128 = vmatmul.bf16.vlgmr.msrb.gmra.mxu0 %v4422_v14  ;;  %v6354_v22 = vld [vmem:[#allocation29_spill] sm:$0xff] }
  0xe0   : > { %1172 = vmatpush.bf16.msra.mxu0 %v4313_v63  ;;  %1141 = vmatmul.bf16.vlgmr.msrb.gmra.mxu1 %v4433_v26 }
  0xe1   : > { %1185 = vmatpush.bf16.msra.mxu1 %v4315_v0  ;;  %1154 = vmatmul.bf16.vlgmr.msrb.gmra.mxu2 %v4613_v6 }
  0xe2   : > { %1198 = vmatpush.bf16.msra.mxu2 %v6333_v61  ;;  %1167 = vmatmul.bf16.vlgmr.msrb.gmra.mxu3 %v4794_v5  ;;  %v906_v61 = vadd.f32 %v905_v42, %v4893_v53 }
  0xe3   : > { %1211 = vmatpush.bf16.msra.mxu3 %v6334_v48  ;;  %v6353_v48 = vld [vmem:[#allocation26_spill] sm:$0xff] }
  0xe4   : > { %1173 = vmatpush.bf16.msra.mxu0 %v6350_v50  ;;  %v918_v29 = vpop.f32.mrf.mxu2  ;;  %v894_v54 = vpop.f32.mrf.mxu0 }
  0xe5   : > { %1186 = vmatpush.bf16.msra.mxu1 %v6351_v1  ;;  %v919_v51 = vadd.f32 %v918_v29, %v906_v61  ;;  %v931_v58 = vpop.f32.mrf.mxu3 }
  0xe6   : > { %1199 = vmatpush.bf16.msra.mxu2 %v6335_v17  ;;  %v6355_v17 = vld [vmem:[#allocation30_spill] sm:$0xff] }
  0xe7   : > { %1212 = vmatpush.bf16.msra.mxu3 %v6336_v28  ;;  %v1110_v28 = vunpack.c.l.b16 %v4422_v14  ;;  %v932_v42 = vadd.f32 %v931_v58, %v919_v51  ;;  %v6358_v58 = vld [vmem:[#allocation44_spill] sm:$0xff]  ;;  %v6359_v51 = vld [vmem:[#allocation45_spill] sm:$0xff] }
  0xe8   : > { %1174 = vmatpush.bf16.msra.mxu0 %v6352_v16 }
  0xe9   : > { %1187 = vmatpush.bf16.msra.mxu1 %v6353_v48 }
  0xea   : > { %1200 = vmatpush.bf16.msra.mxu2 %v6337_v57  ;;  %v907_v57 = vpop.f32.mrf.mxu1 }
  0xeb   : > { %1213 = vmatpush.bf16.msra.mxu3 %v6338_v35  ;;  %v1111_v35 = vpack.c.b16 %v1110_v28, %v1110_v28 }
  0xec   : > { %1175 = vmatpush.bf16.msra.mxu0 %v6354_v22  ;;  %v920_v61 = vpop.f32.mrf.mxu2 }
  0xed   : > { %1188 = vmatpush.bf16.msra.mxu1 %v6355_v17  ;;  %v933_v29 = vpop.f32.mrf.mxu3  ;;  %v1113_v57 = vshrl.u32 %v1111_v35, 16  ;;  %v6360_v61 = vld [vmem:[#allocation48_spill] sm:$0xff] }
  0xee   : > { %1201 = vmatpush.bf16.msra.mxu2 %v6339_v46  ;;  %v1115_v46 = vshll.u32 %v1111_v35, 16  ;;  %v6361_v35 = vld [vmem:[#allocation49_spill] sm:$0xff]  ;;  %v6363_v29 = vld [vmem:[#allocation51_spill] sm:$0xff] }
  0xef   : > { %1214 = vmatpush.bf16.msra.mxu3 %v6340_v39 }
  0xf0   : > { %1176 = vmatpush.bf16.msra.mxu0 %v6356_v45  ;;  %v1117_v28 = vrot.slane %v1115_v46, 1  ;;  %v6362_v46 = vld [vmem:[#allocation50_spill] sm:$0xff] }
  0xf1   : > { %1189 = vmatpush.bf16.msra.mxu1 %v6357_v60 }
  0xf2   : > { %1202 = vmatpush.bf16.msra.mxu2 %v6341_v40  ;;  %v4920_v54 = vor.u32 %v1117_v28, %v1113_v57 }
  0xf3   : > { %1215 = vmatpush.bf16.msra.mxu3 %v6342_v34 }
  0xf4   : > { %1177 = vmatpush.bf16.msra.mxu0 %v6326_v49 }
  0xf5   : > { %1190 = vmatpush.bf16.msra.mxu1 %v6327_v52 }
  0xf6   : > { %1203 = vmatpush.bf16.msra.mxu2 %v6343_v30 }
  0xf7   : > { %1216 = vmatpush.bf16.msra.mxu3 %v6344_v4 }
  0xf8   : > { %1178 = vmatpush.bf16.msra.mxu0 %v6330_v23 }
  0xf9   : > { %1191 = vmatpush.bf16.msra.mxu1 %v4551_v8 }
  0xfa   : > { %1204 = vmatpush.bf16.msra.mxu2 %v6345_v19 }
  0xfb   : > { %1217 = vmatpush.bf16.msra.mxu3 %v4565_v56 }
  0xfc   : > { %1179 = vmatpush.bf16.msra.mxu0 %v6358_v58  ;;  %v944_v57 = vpop.f32.mrf.mxu0 }
  0xfd   : > { %1192 = vmatpush.bf16.msra.mxu1 %v6359_v51  ;;  %v957_v28 = vpop.f32.mrf.mxu1 }
  0xfe   : > { %1205 = vmatpush.bf16.msra.mxu2 %v4598_v41  ;;  %v961_v41 = vmax.f32 %v4896_v38, 0.0 }
  0xff   : > { %1218 = vmatpush.bf16.msra.mxu3 %v4601_v59  ;;  %1180 = vmatmul.bf16.vlgmr.msra.gmra.mxu0 %v4920_v54  ;;  %v6365_v59 = vld [vmem:[#allocation53_spill] sm:$0xff] }
 0x100   : > { %1224 = vmatpush.bf16.msrb.mxu0 %v6360_v61  ;;  %1193 = vmatmul.bf16.vlgmr.msra.gmra.mxu1 %v4422_v14 }
 0x101   : > { %1237 = vmatpush.bf16.msrb.mxu1 %v6361_v35  ;;  %1206 = vmatmul.bf16.vlgmr.msra.gmra.mxu2 %v4433_v26 }
 0x102   : > { %1264 = vmatpush.bf16.msrb.mxu2 %v4014_v7  ;;  %1219 = vmatmul.bf16.vlgmr.msra.gmra.mxu3 %v4613_v6  ;;  %v6364_v7 = vld [vmem:[#allocation52_spill] sm:$0xff] }
 0x103   : > { %1277 = vmatpush.bf16.msrb.mxu3 %v4025_v11  ;;  %v945_v11 = vadd.f32 %v944_v57, %v932_v42 }
 0x104   : > { %1225 = vmatpush.bf16.msrb.mxu0 %v6362_v46  ;;  %v946_v57 = vpop.f32.mrf.mxu0 }
 0x105   : > { %1238 = vmatpush.bf16.msrb.mxu1 %v6363_v29  ;;  %v958_v14 = vadd.f32 %v957_v28, %v945_v11  ;;  %v6368_v11 = vld [vmem:[#allocation56_spill] sm:$0xff]  ;;  %v6369_v28 = vld [vmem:[#allocation57_spill] sm:$0xff] }
 0x106   : > { %1265 = vmatpush.bf16.msrb.mxu2 %v4052_v20  ;;  %v6379_v57 = vld [vmem:[#allocation12_spill] sm:$0xff] }
 0x107   : > { %1278 = vmatpush.bf16.msrb.mxu3 %v4054_v21  ;;  %v962_v56 = vmax.f32 %v958_v14, 0.0  ;;  %v984_v21 = vpop.f32.mrf.mxu2 }
 0x108   : > { %1226 = vmatpush.bf16.msrb.mxu0 %v6364_v7  ;;  %v985_v42 = vadd.f32 %v984_v21, %v4856_v44 }
 0x109   : > { %1239 = vmatpush.bf16.msrb.mxu1 %v6365_v59  ;;  %v4946_v20 = vmax.f32 %v961_v41, %v962_v56 }
 0x10a   : > { %1266 = vmatpush.bf16.msrb.mxu2 %v4089_v33  ;;  %v997_v33 = vpop.f32.mrf.mxu3 }
 0x10b   : > { %1279 = vmatpush.bf16.msrb.mxu3 %v4102_v37  ;;  %v959_v37 = vpop.f32.mrf.mxu1  ;;  %v998_v38 = vadd.f32 %v997_v33, %v985_v42  ;;  %v6378_v42 = vld [vmem:[#allocation11_spill] sm:$0xff]  ;;  %v1254_v33 = vunpack.c.l.b16 %v4433_v26 }
 0x10c   : > { %1227 = vmatpush.bf16.msrb.mxu0 %v4670_v24 }
 0x10d   : > { %1240 = vmatpush.bf16.msrb.mxu1 %v4674_v32 }
 0x10e   : > { %1267 = vmatpush.bf16.msrb.mxu2 %v6346_v12  ;;  %v6366_v12 = vld [vmem:[#allocation54_spill] sm:$0xff] }
 0x10f   : > { %1280 = vmatpush.bf16.msrb.mxu3 %v6347_v43  ;;  %v6367_v43 = vld [vmem:[#allocation55_spill] sm:$0xff]  ;;  %v986_v56 = vpop.f32.mrf.mxu2 }
 0x110   : > { %1228 = vmatpush.bf16.msrb.mxu0 %v4690_v36  ;;  %v6380_v56 = vld [vmem:[#allocation15_spill] sm:$0xff] }
 0x111   : > { %1241 = vmatpush.bf16.msrb.mxu1 %v4694_v15 }
 0x112   : > { %1268 = vmatpush.bf16.msrb.mxu2 %v6348_v25  ;;  %v999_v41 = vpop.f32.mrf.mxu3  ;;  %v6370_v25 = vld [vmem:[#allocation58_spill] sm:$0xff] }
 0x113   : > { %1281 = vmatpush.bf16.msrb.mxu3 %v6349_v3  ;;  %v6371_v3 = vld [vmem:[#allocation59_spill] sm:$0xff] }
 0x114   : > { %1229 = vmatpush.bf16.msrb.mxu0 %v6366_v12 }
 0x115   : > { %1242 = vmatpush.bf16.msrb.mxu1 %v6367_v43 }
 0x116   : > { %1269 = vmatpush.bf16.msrb.mxu2 %v4206_v9  ;;  %v6372_v9 = vld [vmem:[#allocation3_spill] sm:$0xff] }
 0x117   : > { %1282 = vmatpush.bf16.msrb.mxu3 %v4210_v10  ;;  %v6373_v10 = vld [vmem:[#allocation4_spill] sm:$0xff] }
 0x118   : > { %1230 = vmatpush.bf16.msrb.mxu0 %v6368_v11 }
 0x119   : > { %1243 = vmatpush.bf16.msrb.mxu1 %v6369_v28 }
 0x11a   : > { %1270 = vmatpush.bf16.msrb.mxu2 %v4242_v27  ;;  %v6374_v27 = vld [vmem:[#allocation5_spill] sm:$0xff] }
 0x11b   : > { %1283 = vmatpush.bf16.msrb.mxu3 %v4252_v31  ;;  %v6375_v31 = vld [vmem:[#allocation6_spill] sm:$0xff] }
 0x11c   : > { %1231 = vmatpush.bf16.msrb.mxu0 %v6370_v25 }
 0x11d   : > { %1244 = vmatpush.bf16.msrb.mxu1 %v6371_v3 }
 0x11e   : > { %1271 = vmatpush.bf16.msrb.mxu2 %v4287_v47  ;;  %v6376_v47 = vld [vmem:[#allocation7_spill] sm:$0xff] }
 0x11f   : > { %1284 = vmatpush.bf16.msrb.mxu3 %v4300_v55  ;;  %1232 = vmatmul.bf16.vlgmr.msrb.gmra.mxu0 %v4794_v5  ;;  %v1010_v55 = vpop.f32.mrf.mxu0 }
 0x120   : > { %1290 = vmatpush.bf16.msra.mxu0 %v6372_v9  ;;  %1245 = vmatmul.bf16.vlgmr.msrb.gmra.mxu1 %v4920_v54  ;;  %v1011_v14 = vadd.f32 %v1010_v55, %v998_v38 }
 0x121   : > { %1303 = vmatpush.bf16.msra.mxu1 %v6373_v10  ;;  %1272 = vmatmul.bf16.vlgmr.msrb.gmra.mxu2 %v4433_v26 }
 0x122   : > { %1316 = vmatpush.bf16.msra.mxu2 %v4313_v63  ;;  %1285 = vmatmul.bf16.vlgmr.msrb.gmra.mxu3 %v4613_v6  ;;  %v1023_v63 = vpop.f32.mrf.mxu1 }
 0x123   : > { %1329 = vmatpush.bf16.msra.mxu3 %v4315_v0  ;;  %v6377_v0 = vld [vmem:[#allocation8_spill] sm:$0xff]  ;;  %v1024_v21 = vadd.f32 %v1023_v63, %v1011_v14  ;;  %v6393_v14 = vld [vmem:[#allocation47_spill] sm:$0xff] }
 0x124   : > { %1291 = vmatpush.bf16.msra.mxu0 %v6374_v27  ;;  %v6390_v27 = vld [vmem:[#allocation31_spill] sm:$0xff]  ;;  %v3756_v63 = vld [vmem:[%s6127_s2 + $0x64] sm:$0xf0] }
 0x125   : > { %1304 = vmatpush.bf16.msra.mxu1 %v6375_v31  ;;  %v1049_v37 = vpop.f32.mrf.mxu3 }
 0x126   : > { %1317 = vmatpush.bf16.msra.mxu2 %v6350_v50  ;;  %v1036_v50 = vpop.f32.mrf.mxu2 }
 0x127   : > { %1330 = vmatpush.bf16.msra.mxu3 %v6351_v1  ;;  %v4986_v1 = vadd.f32 %v1036_v50, %v1024_v21 }
 0x128   : > { %1292 = vmatpush.bf16.msra.mxu0 %v6376_v47 }
 0x129   : > { %1305 = vmatpush.bf16.msra.mxu1 %v6377_v0  ;;  %v1105_v55 = vmax.f32 %v4986_v1, 0.0  ;;  %v6392_v0 = vld [vmem:[#allocation46_spill] sm:$0xff]  ;;  %v3279_v1 = vld [vmem:[%s6127_s2 + $0x140] sm:$0xf] }
 0x12a   : > { %1318 = vmatpush.bf16.msra.mxu2 %v6352_v16  ;;  %v1012_v16 = vpop.f32.mrf.mxu0  ;;  %v1025_v38 = vpop.f32.mrf.mxu1 }
 0x12b   : > { %1331 = vmatpush.bf16.msra.mxu3 %v6353_v48  ;;  %v1255_v48 = vpack.c.b16 %v1254_v33, %v1254_v33  ;;  %v3159_v33 = vld [vmem:[%s6127_s2 + $0x50] sm:$0xf] }
 0x12c   : > { %1293 = vmatpush.bf16.msra.mxu0 %v6378_v42 }
 0x12d   : > { %1306 = vmatpush.bf16.msra.mxu1 %v6379_v57  ;;  %v1257_v41 = vshrl.u32 %v1255_v48, 16 }
 0x12e   : > { %1319 = vmatpush.bf16.msra.mxu2 %v6354_v22  ;;  %v1259_v22 = vshll.u32 %v1255_v48, 16 }
 0x12f   : > { %1332 = vmatpush.bf16.msra.mxu3 %v6355_v17  ;;  %v1038_v17 = vpop.f32.mrf.mxu2 }
 0x130   : > { %1294 = vmatpush.bf16.msra.mxu0 %v4176_v62  ;;  %v1051_v62 = vpop.f32.mrf.mxu3  ;;  %v1261_v9 = vrot.slane %v1259_v22, 1  ;;  %v3143_v22 = vld [vmem:[%s6127_s2 + $0x30] sm:$0xf]  ;;  %v3750_v17 = vld [vmem:[%s6127_s2 + $0x34] sm:$0xf0] }
 0x131   : > { %1307 = vmatpush.bf16.msra.mxu1 %v4188_v2  ;;  %v6381_v2 = vld [vmem:[#allocation16_spill] sm:$0xff] }
 0x132   : > { %1320 = vmatpush.bf16.msra.mxu2 %v6356_v45  ;;  %v5001_v45 = vor.u32 %v1261_v9, %v1257_v41  ;;  %v3271_v41 = vld [vmem:[%s6127_s2 + $0x130] sm:$0xf]  ;;  %v3782_v9 = vld [vmem:[%s6127_s2 + $0x134] sm:$0xf0] }
 0x133   : > { %1333 = vmatpush.bf16.msra.mxu3 %v6357_v60  ;;  %v6387_v60 = vld [vmem:[#allocation24_spill] sm:$0xff] }
 0x134   : > { %1295 = vmatpush.bf16.msra.mxu0 %v4212_v13  ;;  %v6382_v13 = vld [vmem:[#allocation17_spill] sm:$0xff] }
 0x135   : > { %1308 = vmatpush.bf16.msra.mxu1 %v4224_v18  ;;  %v6383_v18 = vld [vmem:[#allocation18_spill] sm:$0xff] }
 0x136   : > { %1321 = vmatpush.bf16.msra.mxu2 %v6326_v49  ;;  %v6385_v49 = vld [vmem:[#allocation20_spill] sm:$0xff] }
 0x137   : > { %1334 = vmatpush.bf16.msra.mxu3 %v6327_v52  ;;  %v6384_v52 = vld [vmem:[#allocation19_spill] sm:$0xff] }
 0x138   : > { %1296 = vmatpush.bf16.msra.mxu0 %v6380_v56 }
 0x139   : > { %1309 = vmatpush.bf16.msra.mxu1 %v6381_v2 }
 0x13a   : > { %1322 = vmatpush.bf16.msra.mxu2 %v6330_v23  ;;  %v6386_v23 = vld [vmem:[#allocation23_spill] sm:$0xff] }
 0x13b   : > { %1335 = vmatpush.bf16.msra.mxu3 %v4551_v8  ;;  %v1050_v8 = vadd.f32 %v1049_v37, %v4893_v53  ;;  %v3784_v37 = vld [vmem:[%s6127_s2 + $0x144] sm:$0xf0] }
 0x13c   : > { %1297 = vmatpush.bf16.msra.mxu0 %v6382_v13  ;;  %v5119_v48 = vor.u32 %v3784_v37, %v3279_v1  ;;  %v5135_v13 = vor.u32 %v3750_v17, %v3143_v22  ;;  %v3399_v37 = vld [vmem:[%s6127_s2 + $0x230] sm:$0xf] }
 0x13d   : > { %1310 = vmatpush.bf16.msra.mxu1 %v6383_v18  ;;  %v3135_v18 = vld [vmem:[%s6127_s2 + $0x20] sm:$0xf] }
 0x13e   : > { %1323 = vmatpush.bf16.msra.mxu2 %v6358_v58  ;;  %v6388_v58 = vld [vmem:[#allocation27_spill] sm:$0xff] }
 0x13f   : > { %1336 = vmatpush.bf16.msra.mxu3 %v6359_v51  ;;  %1298 = vmatmul.bf16.vlgmr.msra.gmra.mxu0 %v4794_v5  ;;  %v1062_v51 = vpop.f32.mrf.mxu0 }
 0x140   : > { %1342 = vmatpush.bf16.msrb.mxu0 %v6384_v52  ;;  %1311 = vmatmul.bf16.vlgmr.msra.gmra.mxu1 %v4920_v54  ;;  %v3748_v52 = vld [vmem:[%s6127_s2 + $0x24] sm:$0xf0] }
 0x141   : > { %1355 = vmatpush.bf16.msrb.mxu1 %v6385_v49  ;;  %1324 = vmatmul.bf16.vlgmr.msra.gmra.mxu2 %v5001_v45 }
 0x142   : > { %1368 = vmatpush.bf16.msrb.mxu2 %v6360_v61  ;;  %1337 = vmatmul.bf16.vlgmr.msra.gmra.mxu3 %v4433_v26  ;;  %v6389_v61 = vld [vmem:[#allocation28_spill] sm:$0xff]  ;;  %v1063_v26 = vadd.f32 %v1062_v51, %v1050_v8  ;;  %v5153_v51 = vor.u32 %v3748_v52, %v3135_v18  ;;  %v3774_v18 = vld [vmem:[%s6127_s2 + $0xf4] sm:$0xf0]  ;;  %v3773_v52 = vld [vmem:[%s6127_s2 + $0xf4] sm:$0xf] }
 0x143   : > { %1381 = vmatpush.bf16.msrb.mxu3 %v6361_v35  ;;  %v1075_v35 = vpop.f32.mrf.mxu1  ;;  %v3780_v8 = vld [vmem:[%s6127_s2 + $0x124] sm:$0xf0] }
 0x144   : > { %1343 = vmatpush.bf16.msrb.mxu0 %v6386_v23  ;;  %v1076_v10 = vadd.f32 %v1075_v35, %v1063_v26  ;;  %v3263_v23 = vld [vmem:[%s6127_s2 + $0x120] sm:$0xf] }
 0x145   : > { %1356 = vmatpush.bf16.msrb.mxu1 %v6387_v60  ;;  %v1101_v31 = vpop.f32.mrf.mxu3  ;;  %v5156_v35 = vor.u32 %v3780_v8, %v3263_v23  ;;  %v3241_v23 = vld [vmem:[%s6127_s2 + $0xf8] sm:$0xf0]  ;;  %v3367_v8 = vld [vmem:[%s6127_s2 + $0x1f0] sm:$0xf] }
 0x146   : > { %1369 = vmatpush.bf16.msrb.mxu2 %v6362_v46  ;;  %v1088_v46 = vpop.f32.mrf.mxu2 }
 0x147   : > { %1382 = vmatpush.bf16.msrb.mxu3 %v6363_v29  ;;  %v1089_v29 = vadd.f32 %v1088_v46, %v1076_v10  ;;  %v3127_v10 = vld [vmem:[%s6127_s2 + $0x10] sm:$0xf] }
 0x148   : > { %1344 = vmatpush.bf16.msrb.mxu0 %v6388_v58 }
 0x149   : > { %1357 = vmatpush.bf16.msrb.mxu1 %v6389_v61  ;;  %v1102_v47 = vadd.f32 %v1101_v31, %v1089_v29  ;;  %v3255_v29 = vld [vmem:[%s6127_s2 + $0x110] sm:$0xf]  ;;  %v3778_v31 = vld [vmem:[%s6127_s2 + $0x114] sm:$0xf0] }
 0x14a   : > { %1370 = vmatpush.bf16.msrb.mxu2 %v6364_v7  ;;  %v1064_v7 = vpop.f32.mrf.mxu0 }
 0x14b   : > { %1383 = vmatpush.bf16.msrb.mxu3 %v6365_v59  ;;  %v1077_v59 = vpop.f32.mrf.mxu1  ;;  %v5174_v7 = vor.u32 %v3778_v31, %v3255_v29 }
 0x14c   : > { %1345 = vmatpush.bf16.msrb.mxu0 %v6390_v27  ;;  %v3746_v27 = vld [vmem:[%s6127_s2 + $0x14] sm:$0xf0]  ;;  %v3119_v59 = vld [vmem:[%s6127_s2] sm:$0xf] }
 0x14d   : > { %1358 = vmatpush.bf16.msrb.mxu1 %v6340_v39  ;;  %v1106_v39 = vmax.f32 %v1102_v47, 0.0  ;;  %v5171_v47 = vor.u32 %v3746_v27, %v3127_v10  ;;  %v3231_v27 = vld [vmem:[%s6127_s2 + $0xe0] sm:$0xf] }
 0x14e   : > { %1371 = vmatpush.bf16.msrb.mxu2 %v4670_v24 }
 0x14f   : > { %1384 = vmatpush.bf16.msrb.mxu3 %v4674_v32  ;;  %v1107_v24 = vmax.f32 %v1105_v55, %v1106_v39  ;;  %v1090_v32 = vpop.f32.mrf.mxu2  ;;  %v3744_v55 = vld [vmem:[%s6127_s2 + $0x4] sm:$0xf0]  ;;  %v3247_v39 = vld [vmem:[%s6127_s2 + $0x100] sm:$0xf] }
 0x150   : > { %1346 = vmatpush.bf16.msrb.mxu0 %v6341_v40  ;;  %v3776_v32 = vld [vmem:[%s6127_s2 + $0x104] sm:$0xf0] }
 0x151   : > { %1359 = vmatpush.bf16.msrb.mxu1 %v6342_v34  ;;  %v5036_v40 = vmax.f32 %v4946_v20, %v1107_v24  ;;  %v1103_v34 = vpop.f32.mrf.mxu3  ;;  %v6391_v20 = vld [vmem:[#allocation43_spill] sm:$0xff] }
 0x152   : > { %1372 = vmatpush.bf16.msrb.mxu2 %v4690_v36  ;;  %v3175_v36 = vld [vmem:[%s6127_s2 + $0x70] sm:$0xf] }
 0x153   : > { %1385 = vmatpush.bf16.msrb.mxu3 %v4694_v15  ;;  %v3758_v15 = vld [vmem:[%s6127_s2 + $0x74] sm:$0xf0]  ;;  %v3431_v34 = vld [vmem:[%s6127_s2 + $0x270] sm:$0xf] }
 0x154   : > { %1347 = vmatpush.bf16.msrb.mxu0 %v6343_v30  ;;  %v3303_v30 = vld [vmem:[%s6127_s2 + $0x170] sm:$0xf] }
 0x155   : > { %1360 = vmatpush.bf16.msrb.mxu1 %v6344_v4  ;;  %v3790_v4 = vld [vmem:[%s6127_s2 + $0x174] sm:$0xf0] }
 0x156   : > { %1373 = vmatpush.bf16.msrb.mxu2 %v6366_v12  ;;  %v5055_v12 = vor.u32 %v3758_v15, %v3175_v36  ;;  %v3822_v36 = vld [vmem:[%s6127_s2 + $0x274] sm:$0xf0] }
 0x157   : > { %1386 = vmatpush.bf16.msrb.mxu3 %v6367_v43  ;;  %v5057_v43 = vor.u32 %v3790_v4, %v3303_v30  ;;  %v5195_v30 = vor.u32 %v3744_v55, %v3119_v59  ;;  %v5198_v4 = vor.u32 %v3776_v32, %v3247_v39  ;;  %v3772_v55 = vld [vmem:[%s6127_s2 + $0xe4] sm:$0xf0]  ;;  %v3771_v39 = vld [vmem:[%s6127_s2 + $0xe4] sm:$0xf]  ;;  %v3810_v32 = vld [vmem:[%s6127_s2 + $0x214] sm:$0xf0] }
 0x158   : > { %1348 = vmatpush.bf16.msrb.mxu0 %v6345_v19  ;;  %v3167_v19 = vld [vmem:[%s6127_s2 + $0x60] sm:$0xf] }
 0x159   : > { %1361 = vmatpush.bf16.msrb.mxu1 %v6391_v20  ;;  %v5076_v21 = vor.u32 %v3756_v63, %v3167_v19  ;;  %v5200_v20 = vor.u32 %v3822_v36, %v3431_v34  ;;  %v1399_v19 = vrot.slane %v5036_v40, 1  ;;  %v3423_v63 = vld [vmem:[%s6127_s2 + $0x260] sm:$0xf]  ;;  %v5306_v36 = vor.u32 %v3772_v55, %v3231_v27 }
 0x15a   : > { %1374 = vmatpush.bf16.msrb.mxu2 %v6368_v11  ;;  %v3295_v11 = vld [vmem:[%s6127_s2 + $0x160] sm:$0xf]  ;;  %v1404_v55 = vrot.slane %v5036_v40, 2 }
 0x15b   : > { %1387 = vmatpush.bf16.msrb.mxu3 %v6369_v28  ;;  %v3788_v28 = vld [vmem:[%s6127_s2 + $0x164] sm:$0xf0] }
 0x15c   : > { %1349 = vmatpush.bf16.msrb.mxu0 %v6392_v0  ;;  %v5080_v42 = vor.u32 %v3788_v28, %v3295_v11  ;;  %v1129_v38 = vpop.f32.mrf.mxu0  ;;  %v3820_v0 = vld [vmem:[%s6127_s2 + $0x264] sm:$0xf0]  ;;  %v5214_v11 = vpack.c.bf16 %v5036_v40, %v5036_v40  ;;  %v3207_v40 = vld [vmem:[%s6127_s2 + $0xb0] sm:$0xf] }
 0x15d   : > { %1362 = vmatpush.bf16.msrb.mxu1 %v6393_v14  ;;  %v1130_v62 = vadd.f32 %v1129_v38, %v4856_v44  ;;  %v1142_v56 = vpop.f32.mrf.mxu1  ;;  %v5216_v28 = vor.u32 %v3820_v0, %v3423_v63  ;;  %v5218_v14 = vpack.c.bf16 %v1399_v19, %v1399_v19  ;;  %v3814_v38 = vld [vmem:[%s6127_s2 + $0x234] sm:$0xf0]  ;;  %v3359_v19 = vld [vmem:[%s6127_s2 + $0x1e0] sm:$0xf]  ;;  %v3804_v63 = vld [vmem:[%s6127_s2 + $0x1e4] sm:$0xf0] }
 0x15e   : > { %1375 = vmatpush.bf16.msrb.mxu2 %v6370_v25  ;;  %v3754_v25 = vld [vmem:[%s6127_s2 + $0x54] sm:$0xf0] }
 0x15f   : > { %1388 = vmatpush.bf16.msrb.mxu3 %v6371_v3  ;;  %1350 = vmatmul.bf16.vlgmr.msrb.gmra.mxu0 %v4613_v6  ;;  %v3287_v3 = vld [vmem:[%s6127_s2 + $0x150] sm:$0xf]  ;;  %v3786_v6 = vld [vmem:[%s6127_s2 + $0x154] sm:$0xf0]  ;;  %v5098_v57 = vor.u32 %v3754_v25, %v3159_v33  ;;  %v1143_v2 = vadd.f32 %v1142_v56, %v1130_v62  ;;  %v5249_v62 = vor.u32 %v3814_v38, %v3399_v37  ;;  %v3391_v56 = vld [vmem:[%s6127_s2 + $0x220] sm:$0xf] }
 0x160   : > { %1893 = vmatpush.bf16.msra.mxu0 %v5055_v12  ;;  %1363 = vmatmul.bf16.vlgmr.msrb.gmra.mxu1 %v4794_v5  ;;  %v5101_v50 = vor.u32 %v3786_v6, %v3287_v3  ;;  %v3151_v5 = vld [vmem:[%s6127_s2 + $0x40] sm:$0xf]  ;;  %v3415_v33 = vld [vmem:[%s6127_s2 + $0x250] sm:$0xf]  ;;  %v3818_v25 = vld [vmem:[%s6127_s2 + $0x254] sm:$0xf0] }
 0x161   : > { %1376 = vmatmul.bf16.vlgmr.msrb.gmra.mxu2 %v4920_v54  ;;  %v3752_v54 = vld [vmem:[%s6127_s2 + $0x44] sm:$0xf0]  ;;  %v5229_v3 = vor.u32 %v3818_v25, %v3415_v33  ;;  %v3407_v6 = vld [vmem:[%s6127_s2 + $0x240] sm:$0xf]  ;;  %v5318_v33 = vor.u32 %v3804_v63, %v3359_v19  ;;  %v3223_v25 = vld [vmem:[%s6127_s2 + $0xd0] sm:$0xf] }
 0x162   : > { %1919 = vmatpush.bf16.msra.mxu2 %v5057_v43  ;;  %1389 = vmatmul.bf16.vlgmr.msrb.gmra.mxu3 %v5001_v45  ;;  %v5116_v16 = vor.u32 %v3752_v54, %v3151_v5  ;;  %v5138_v45 = vor.u32 %v3782_v9, %v3271_v41  ;;  %v3816_v5 = vld [vmem:[%s6127_s2 + $0x244] sm:$0xf0]  ;;  %v3351_v37 = vld [vmem:[%s6127_s2 + $0x1d0] sm:$0xf]  ;;  %v3766_v63 = vld [vmem:[%s6127_s2 + $0xb4] sm:$0xf0] }
 0x163   : > { %v5238_v54 = vor.u32 %v3816_v5, %v3407_v6  ;;  %v3812_v41 = vld [vmem:[%s6127_s2 + $0x224] sm:$0xf0]  ;;  %v3770_v6 = vld [vmem:[%s6127_s2 + $0xd4] sm:$0xf0]  ;;  %v3769_v5 = vld [vmem:[%s6127_s2 + $0xd4] sm:$0xf] }
 0x164   : > { %1894 = vmatpush.bf16.msra.mxu0 %v5076_v21  ;;  %v1155_v49 = vpop.f32.mrf.mxu2  ;;  %v1131_v26 = vpop.f32.mrf.mxu0 }
 0x165   : > { %v1156_v60 = vadd.f32 %v1155_v49, %v1143_v2  ;;  %v1168_v58 = vpop.f32.mrf.mxu3  ;;  %v1144_v46 = vpop.f32.mrf.mxu1  ;;  %v3239_v2 = vld [vmem:[%s6127_s2 + $0xf0] sm:$0xf]  ;;  %v5281_v26 = vor.u32 %v3773_v52, %v3241_v23  ;;  %v3215_v23 = vld [vmem:[%s6127_s2 + $0xc0] sm:$0xf] }
 0x166   : > { %1920 = vmatpush.bf16.msra.mxu2 %v5080_v42  ;;  %v5267_v49 = vor.u32 %v3774_v18, %v3239_v2  ;;  %v5289_v46 = vor.u32 %v3812_v41, %v3391_v56  ;;  %v3808_v56 = vld [vmem:[%s6127_s2 + $0x204] sm:$0xf0]  ;;  %v5345_v41 = vor.u32 %v3770_v6, %v3223_v25  ;;  %v3805_v2 = vld [vmem:[%s6127_s2 + $0x1f4] sm:$0xf]  ;;  %v3361_v25 = vld [vmem:[%s6127_s2 + $0x1e8] sm:$0xf0] }
 0x167   : > { %v1169_v61 = vadd.f32 %v1168_v58, %v1156_v60  ;;  %v3806_v60 = vld [vmem:[%s6127_s2 + $0x1f4] sm:$0xf0]  ;;  %v3383_v58 = vld [vmem:[%s6127_s2 + $0x210] sm:$0xf] }
 0x168   : > { %1895 = vmatpush.bf16.msra.mxu0 %v5098_v57  ;;  %v5283_v10 = vor.u32 %v3806_v60, %v3367_v8  ;;  %1906 = vmatpush.bf16.msra.mxu1 %v5267_v49  ;;  %v5336_v38 = vor.u32 %v3810_v32, %v3383_v58  ;;  %v3768_v8 = vld [vmem:[%s6127_s2 + $0xc4] sm:$0xf0]  ;;  %v3369_v60 = vld [vmem:[%s6127_s2 + $0x1f8] sm:$0xf0]  ;;  %v3767_v58 = vld [vmem:[%s6127_s2 + $0xc4] sm:$0xf] }
 0x169   : > { %v5387_v32 = vor.u32 %v3805_v2, %v3369_v60  ;;  %v3801_v2 = vld [vmem:[%s6127_s2 + $0x1d4] sm:$0xf]  ;;  %v3799_v60 = vld [vmem:[%s6127_s2 + $0x1c4] sm:$0xf] }
 0x16a   : > { %1921 = vmatpush.bf16.msra.mxu2 %v5101_v50  ;;  %1932 = vmatpush.bf16.msra.mxu3 %v5283_v10 }
 0x16c   : > { %1896 = vmatpush.bf16.msra.mxu0 %v5116_v16  ;;  %v1157_v24 = vpop.f32.mrf.mxu2  ;;  %1907 = vmatpush.bf16.msra.mxu1 %v5306_v36 }
 0x16d   : > { %v1170_v15 = vpop.f32.mrf.mxu3  ;;  %v3233_v24 = vld [vmem:[%s6127_s2 + $0xe8] sm:$0xf0] }
 0x16e   : > { %1922 = vmatpush.bf16.msra.mxu2 %v5119_v48  ;;  %v5308_v15 = vor.u32 %v3771_v39, %v3233_v24  ;;  %1933 = vmatpush.bf16.msra.mxu3 %v5318_v33  ;;  %v5385_v24 = vor.u32 %v3768_v8, %v3215_v23  ;;  %v3353_v23 = vld [vmem:[%s6127_s2 + $0x1d8] sm:$0xf0] }
 0x16f   : > { %v5435_v8 = vor.u32 %v3801_v2, %v3353_v23  ;;  %v3763_v2 = vld [vmem:[%s6127_s2 + $0xa4] sm:$0xf]  ;;  %v3201_v23 = vld [vmem:[%s6127_s2 + $0xa8] sm:$0xf0] }
 0x170   : > { %1897 = vmatpush.bf16.msra.mxu0 %v5135_v13  ;;  %1908 = vmatpush.bf16.msra.mxu1 %v5345_v41 }
 0x171   : > { %6397 = vst [vmem:[#allocation32_spill] sm:$0xff] %v5435_v8 }
 0x172   : > { %1923 = vmatpush.bf16.msra.mxu2 %v5138_v45 }
 0x174   : > { %1898 = vmatpush.bf16.msra.mxu0 %v5153_v51  ;;  %1909 = vmatpush.bf16.msra.mxu1 %v5385_v24 }
 0x176   : > { %1924 = vmatpush.bf16.msra.mxu2 %v5156_v35 }
 0x178   : > { %1899 = vmatpush.bf16.msra.mxu0 %v5171_v47 }
 0x17a   : > { %1925 = vmatpush.bf16.msra.mxu2 %v5174_v7 }
 0x17c   : > { %1900 = vmatpush.bf16.msra.mxu0 %v5195_v30  ;;  %v1181_v1 = vpop.f32.mrf.mxu0 }
 0x17d   : > { %v5246_v22 = vadd.f32 %v1181_v1, %v1169_v61  ;;  %v1194_v17 = vpop.f32.mrf.mxu1  ;;  %v3225_v1 = vld [vmem:[%s6127_s2 + $0xd8] sm:$0xf0] }
 0x17e   : > { %1926 = vmatpush.bf16.msra.mxu2 %v5198_v4  ;;  %v1195_v9 = vadd.f32 %v1194_v17, %v4893_v53  ;;  %v3375_v17 = vld [vmem:[%s6127_s2 + $0x200] sm:$0xf]  ;;  %v5355_v18 = vor.u32 %v3769_v5, %v3225_v1  ;;  %v3765_v5 = vld [vmem:[%s6127_s2 + $0xb4] sm:$0xf]  ;;  %v3209_v1 = vld [vmem:[%s6127_s2 + $0xb8] sm:$0xf0] }
 0x17f   : > { %1901 = vmatmul.bf16.vlgmr.msra.gmra.mxu0 %v5214_v11 }
 0x180   : > { %1945 = vmatpush.bf16.msrb.mxu0 %v5200_v20 }
 0x181   : > { %1927 = vmatmul.bf16.vlgmr.msra.gmra.mxu2 %v5218_v14 }
 0x182   : > { %1971 = vmatpush.bf16.msrb.mxu2 %v5281_v26 }
 0x184   : > { %1946 = vmatpush.bf16.msrb.mxu0 %v5216_v28  ;;  %v1207_v61 = vpop.f32.mrf.mxu2  ;;  %v1183_v29 = vpop.f32.mrf.mxu0 }
 0x185   : > { %v1208_v31 = vadd.f32 %v1207_v61, %v1195_v9  ;;  %v1220_v59 = vpop.f32.mrf.mxu3  ;;  %v1196_v34 = vpop.f32.mrf.mxu1  ;;  %v3802_v9 = vld [vmem:[%s6127_s2 + $0x1d4] sm:$0xf0]  ;;  %v3217_v61 = vld [vmem:[%s6127_s2 + $0xc8] sm:$0xf0]  ;;  %v3343_v29 = vld [vmem:[%s6127_s2 + $0x1c0] sm:$0xf] }
 0x186   : > { %1972 = vmatpush.bf16.msrb.mxu2 %v5308_v15  ;;  %v5357_v52 = vor.u32 %v3802_v9, %v3351_v37  ;;  %v3803_v34 = vld [vmem:[%s6127_s2 + $0x1e4] sm:$0xf]  ;;  %v5394_v19 = vor.u32 %v3767_v58, %v3217_v61  ;;  %v5415_v37 = vor.u32 %v3766_v63, %v3207_v40  ;;  %v5423_v9 = vor.u32 %v3765_v5, %v3209_v1  ;;  %v3345_v58 = vld [vmem:[%s6127_s2 + $0x1c8] sm:$0xf0]  ;;  %v3797_v40 = vld [vmem:[%s6127_s2 + $0x1b4] sm:$0xf] }
 0x187   : > { %v5316_v0 = vadd.f32 %v1220_v59, %v1208_v31  ;;  %v3800_v31 = vld [vmem:[%s6127_s2 + $0x1c4] sm:$0xf0]  ;;  %v5381_v59 = vor.u32 %v3808_v56, %v3375_v17  ;;  %v5417_v17 = vpack.c.bf16 %v1404_v55, %v1404_v55  ;;  %v5420_v56 = vor.u32 %v3803_v34, %v3361_v25  ;;  %v3337_v63 = vld [vmem:[%s6127_s2 + $0x1b8] sm:$0xf0]  ;;  %v3199_v25 = vld [vmem:[%s6127_s2 + $0xa0] sm:$0xf] }
 0x188   : > { %1947 = vmatpush.bf16.msrb.mxu0 %v5229_v3  ;;  %6394 = vst [vmem:[#allocation37_spill] sm:$0xff] %v5357_v52  ;;  %1934 = vmatpush.bf16.msra.mxu3 %v5357_v52  ;;  %v5405_v6 = vor.u32 %v3800_v31, %v3343_v29  ;;  %v5445_v61 = vor.u32 %v3799_v60, %v3345_v58  ;;  %v3335_v29 = vld [vmem:[%s6127_s2 + $0x1b0] sm:$0xf]  ;;  %v3798_v31 = vld [vmem:[%s6127_s2 + $0x1b4] sm:$0xf0] }
 0x189   : > { %6396 = vst [vmem:[#allocation41_spill] sm:$0xff] %v5420_v56  ;;  %1910 = vmatpush.bf16.msra.mxu1 %v5415_v37  ;;  %v5454_v34 = vor.u32 %v3798_v31, %v3335_v29  ;;  %v3764_v1 = vld [vmem:[%s6127_s2 + $0xa4] sm:$0xf0]  ;;  %v5480_v58 = vor.u32 %v3763_v2, %v3201_v23  ;;  %v3191_v2 = vld [vmem:[%s6127_s2 + $0x90] sm:$0xf] }
 0x18a   : > { %1973 = vmatpush.bf16.msrb.mxu2 %v5355_v18  ;;  %6395 = vst [vmem:[#allocation38_spill] sm:$0xff] %v5405_v6  ;;  %v5478_v60 = vor.u32 %v3764_v1, %v3199_v25  ;;  %v3329_v1 = vld [vmem:[%s6127_s2 + $0x1a8] sm:$0xf0]  ;;  %v3762_v23 = vld [vmem:[%s6127_s2 + $0x94] sm:$0xf0] }
 0x18b   : > { %6398 = vst [vmem:[#allocation35_spill] sm:$0xff] %v5445_v61  ;;  %v3169_v52 = vld [vmem:[%s6127_s2 + $0x68] sm:$0xf0] }
 0x18c   : > { %1948 = vmatpush.bf16.msrb.mxu0 %v5238_v54  ;;  %v1209_v27 = vpop.f32.mrf.mxu2  ;;  %1935 = vmatpush.bf16.msra.mxu3 %v5405_v6  ;;  %6399 = vst [vmem:[#allocation36_spill] sm:$0xff] %v5454_v34  ;;  %v3789_v6 = vld [vmem:[%s6127_s2 + $0x174] sm:$0xf] }
 0x18d   : > { %v1222_v39 = vpop.f32.mrf.mxu3  ;;  %1911 = vmatpush.bf16.msra.mxu1 %v5478_v60 }
 0x18e   : > { %1974 = vmatpush.bf16.msrb.mxu2 %v5394_v19 }
 0x190   : > { %1949 = vmatpush.bf16.msrb.mxu0 %v5249_v62  ;;  %1936 = vmatpush.bf16.msra.mxu3 %v5454_v34 }
 0x192   : > { %1975 = vmatpush.bf16.msrb.mxu2 %v5423_v9 }
 0x194   : > { %1950 = vmatpush.bf16.msrb.mxu0 %v5289_v46 }
 0x196   : > { %1976 = vmatpush.bf16.msrb.mxu2 %v5480_v58 }
 0x198   : > { %1951 = vmatpush.bf16.msrb.mxu0 %v5336_v38 }
 0x19c   : > { %1952 = vmatpush.bf16.msrb.mxu0 %v5381_v59  ;;  %v1233_v27 = vpop.f32.mrf.mxu0 }
 0x19d   : > { %v1234_v55 = vadd.f32 %v1233_v27, %v5316_v0  ;;  %v1246_v39 = vpop.f32.mrf.mxu1  ;;  %v5467_v0 = vor.u32 %v3797_v40, %v3337_v63  ;;  %v1250_v27 = vmax.f32 %v5246_v22, 0.0  ;;  %v3796_v40 = vld [vmem:[%s6127_s2 + $0x1a4] sm:$0xf0]  ;;  %v3795_v22 = vld [vmem:[%s6127_s2 + $0x1a4] sm:$0xf] }
 0x19f   : > { %1953 = vmatmul.bf16.vlgmr.msrb.gmra.mxu0 %v5417_v17  ;;  %v1247_v5 = vadd.f32 %v1246_v39, %v1234_v55  ;;  %6400 = vst [vmem:[#allocation39_spill] sm:$0xff] %v5467_v0  ;;  %v3327_v39 = vld [vmem:[%s6127_s2 + $0x1a0] sm:$0xf] }
 0x1a0   : > { %1997 = vmatpush.bf16.msra.mxu0 %v5387_v32 }
 0x1a1   : > { %v1251_v29 = vmax.f32 %v1247_v5, 0.0  ;;  %v5501_v5 = vor.u32 %v3796_v40, %v3327_v39  ;;  %v3761_v39 = vld [vmem:[%s6127_s2 + $0x94] sm:$0xf]  ;;  %v3193_v40 = vld [vmem:[%s6127_s2 + $0x98] sm:$0xf0] }
 0x1a2   : > { %v5526_v34 = vor.u32 %v3761_v39, %v3193_v40  ;;  %v3183_v39 = vld [vmem:[%s6127_s2 + $0x80] sm:$0xf]  ;;  %v3760_v40 = vld [vmem:[%s6127_s2 + $0x84] sm:$0xf0] }
 0x1a3   : > { %v5485_v31 = vmax.f32 %v1250_v27, %v1251_v29  ;;  %6401 = vst [vmem:[#allocation40_spill] sm:$0xff] %v5501_v5  ;;  %v5512_v29 = vor.u32 %v3795_v22, %v3329_v1  ;;  %1937 = vmatpush.bf16.msra.mxu3 %v5501_v5  ;;  %v3794_v22 = vld [vmem:[%s6127_s2 + $0x194] sm:$0xf0]  ;;  %v3793_v1 = vld [vmem:[%s6127_s2 + $0x194] sm:$0xf] }
 0x1a4   : > { %1998 = vmatpush.bf16.msra.mxu0 %v5420_v56  ;;  %v5487_v55 = vpop.f32.mrf.mxu2  ;;  %v1235_v25 = vpop.f32.mrf.mxu0  ;;  %v3759_v5 = vld [vmem:[%s6127_s2 + $0x84] sm:$0xf]  ;;  %1977 = vmatpush.bf16.msrb.mxu2 %v5526_v34 }
 0x1a5   : > { %v5499_v63 = vpop.f32.mrf.mxu3  ;;  %v1248_v27 = vpop.f32.mrf.mxu1  ;;  %6402 = vst [vmem:[#allocation42_spill] sm:$0xff] %v5512_v29  ;;  %v3319_v25 = vld [vmem:[%s6127_s2 + $0x190] sm:$0xf] }
 0x1a8   : > { %1999 = vmatpush.bf16.msra.mxu0 %v5435_v8 }
 0x1ac   : > { %2000 = vmatpush.bf16.msra.mxu0 %v5445_v61 }
 0x1ad   : > { %v1288_v56 = vpop.f32.mrf.mxu3 }
 0x1ae   : > { %v3753_v56 = vld [vmem:[%s6127_s2 + $0x54] sm:$0xf] }
 0x1b0   : > { %2001 = vmatpush.bf16.msra.mxu0 %v5467_v0  ;;  %v5514_v0 = vor.u32 %v3762_v23, %v3191_v2  ;;  %v3321_v2 = vld [vmem:[%s6127_s2 + $0x198] sm:$0xf0]  ;;  %v5539_v23 = vor.u32 %v3794_v22, %v3319_v25  ;;  %v3185_v25 = vld [vmem:[%s6127_s2 + $0x88] sm:$0xf0]  ;;  %v3757_v22 = vld [vmem:[%s6127_s2 + $0x74] sm:$0xf] }
 0x1b1   : > { %v5541_v27 = vor.u32 %v3793_v1, %v3321_v2  ;;  %v3177_v1 = vld [vmem:[%s6127_s2 + $0x78] sm:$0xf0]  ;;  %v5564_v2 = vor.u32 %v3759_v5, %v3185_v25  ;;  %v3791_v25 = vld [vmem:[%s6127_s2 + $0x184] sm:$0xf] }
 0x1b2   : > { %1912 = vmatpush.bf16.msra.mxu1 %v5514_v0  ;;  %6403 = vst [vmem:[#allocation9_spill] sm:$0xff] %v5539_v23  ;;  %v5566_v61 = vor.u32 %v3757_v22, %v3177_v1  ;;  %1938 = vmatpush.bf16.msra.mxu3 %v5539_v23  ;;  %v3305_v5 = vld [vmem:[%s6127_s2 + $0x178] sm:$0xf0]  ;;  %v3313_v22 = vld [vmem:[%s6127_s2 + $0x188] sm:$0xf0]  ;;  %v1275_v1 = vpop.f32.mrf.mxu2 }
 0x1b3   : > { %v5591_v23 = vor.u32 %v3789_v6, %v3305_v5  ;;  %1978 = vmatpush.bf16.msrb.mxu2 %v5564_v2  ;;  %v3787_v6 = vld [vmem:[%s6127_s2 + $0x164] sm:$0xf]  ;;  %v3297_v5 = vld [vmem:[%s6127_s2 + $0x168] sm:$0xf0] }
 0x1b4   : > { %2002 = vmatpush.bf16.msra.mxu0 %v5512_v29  ;;  %v5553_v29 = vor.u32 %v3760_v40, %v3183_v39  ;;  %v3311_v39 = vld [vmem:[%s6127_s2 + $0x180] sm:$0xf]  ;;  %v3792_v40 = vld [vmem:[%s6127_s2 + $0x184] sm:$0xf0] }
 0x1b5   : > { %v5578_v8 = vor.u32 %v3792_v40, %v3311_v39  ;;  %6405 = vst [vmem:[#allocation13_spill] sm:$0xff] %v5591_v23  ;;  %v5593_v39 = vor.u32 %v3791_v25, %v3313_v22  ;;  %v3755_v40 = vld [vmem:[%s6127_s2 + $0x64] sm:$0xf]  ;;  %v3161_v25 = vld [vmem:[%s6127_s2 + $0x58] sm:$0xf0] }
 0x1b6   : > { %1913 = vmatpush.bf16.msra.mxu1 %v5553_v29  ;;  %v5603_v1 = vor.u32 %v3755_v40, %v3169_v52  ;;  %v5621_v52 = vor.u32 %v3787_v6, %v3297_v5  ;;  %v3785_v22 = vld [vmem:[%s6127_s2 + $0x154] sm:$0xf]  ;;  %v3783_v6 = vld [vmem:[%s6127_s2 + $0x144] sm:$0xf] }
 0x1b7   : > { %6404 = vst [vmem:[#allocation10_spill] sm:$0xff] %v5578_v8  ;;  %2029 = vmatpush.bf16.msra.mxu2 %v5055_v12  ;;  %1939 = vmatpush.bf16.msra.mxu3 %v5578_v8  ;;  %v5625_v12 = vor.u32 %v3753_v56, %v3161_v25 }
 0x1b8   : > { %2003 = vmatpush.bf16.msra.mxu0 %v5541_v27  ;;  %6406 = vst [vmem:[#allocation14_spill] sm:$0xff] %v5593_v39 }
 0x1b9   : > { %6407 = vst [vmem:[#allocation21_spill] sm:$0xff] %v5621_v52 }
 0x1ba   : > { %1958 = vmatpush.bf16.msrb.mxu1 %v5566_v61 }
 0x1bb   : > { %1984 = vmatpush.bf16.msrb.mxu3 %v5591_v23  ;;  %2030 = vmatpush.bf16.msra.mxu2 %v5076_v21  ;;  %v3751_v21 = vld [vmem:[%s6127_s2 + $0x44] sm:$0xf] }
 0x1bc   : > { %2004 = vmatpush.bf16.msra.mxu0 %v5593_v39  ;;  %v1299_v5 = vpop.f32.mrf.mxu0 }
 0x1bd   : > { %v1312_v25 = vpop.f32.mrf.mxu1 }
 0x1be   : > { %1959 = vmatpush.bf16.msrb.mxu1 %v5603_v1 }
 0x1bf   : > { %1985 = vmatpush.bf16.msrb.mxu3 %v5621_v52  ;;  %2031 = vmatpush.bf16.msra.mxu2 %v5098_v57 }
 0x1c0   : > { %2055 = vmatpush.bf16.msrb.mxu0 %v5057_v43  ;;  %v3289_v43 = vld [vmem:[%s6127_s2 + $0x158] sm:$0xf0] }
 0x1c1   : > { %v5638_v40 = vor.u32 %v3785_v22, %v3289_v43  ;;  %v3145_v22 = vld [vmem:[%s6127_s2 + $0x38] sm:$0xf0] }
 0x1c2   : > { %1960 = vmatpush.bf16.msrb.mxu1 %v5625_v12 }
 0x1c3   : > { %6408 = vst [vmem:[#allocation22_spill] sm:$0xff] %v5638_v40  ;;  %1986 = vmatpush.bf16.msrb.mxu3 %v5638_v40  ;;  %2032 = vmatpush.bf16.msra.mxu2 %v5116_v16  ;;  %v3749_v16 = vld [vmem:[%s6127_s2 + $0x34] sm:$0xf] }
 0x1c4   : > { %2056 = vmatpush.bf16.msrb.mxu0 %v5080_v42  ;;  %v3153_v42 = vld [vmem:[%s6127_s2 + $0x48] sm:$0xf0]  ;;  %v5668_v43 = vor.u32 %v3749_v16, %v3145_v22 }
 0x1c5   : > { %v5648_v57 = vor.u32 %v3751_v21, %v3153_v42  ;;  %v3781_v21 = vld [vmem:[%s6127_s2 + $0x134] sm:$0xf]  ;;  %v1338_v16 = vpop.f32.mrf.mxu3  ;;  %v1314_v40 = vpop.f32.mrf.mxu1 }
 0x1c6   : > { %v3777_v40 = vld [vmem:[%s6127_s2 + $0x114] sm:$0xf] }
 0x1c7   : > { %1961 = vmatpush.bf16.msrb.mxu1 %v5648_v57  ;;  %2033 = vmatpush.bf16.msra.mxu2 %v5135_v13  ;;  %v3137_v13 = vld [vmem:[%s6127_s2 + $0x28] sm:$0xf0] }
 0x1c8   : > { %2057 = vmatpush.bf16.msrb.mxu0 %v5101_v50  ;;  %v3281_v50 = vld [vmem:[%s6127_s2 + $0x148] sm:$0xf0] }
 0x1c9   : > { %v5658_v56 = vor.u32 %v3783_v6, %v3281_v50  ;;  %v1325_v6 = vpop.f32.mrf.mxu2  ;;  %v3747_v50 = vld [vmem:[%s6127_s2 + $0x24] sm:$0xf] }
 0x1ca   : > { %v5688_v22 = vor.u32 %v3747_v50, %v3137_v13  ;;  %v3129_v50 = vld [vmem:[%s6127_s2 + $0x18] sm:$0xf0] }
 0x1cb   : > { %6409 = vst [vmem:[#allocation25_spill] sm:$0xff] %v5658_v56  ;;  %1987 = vmatpush.bf16.msrb.mxu3 %v5658_v56  ;;  %1962 = vmatpush.bf16.msrb.mxu1 %v5668_v43 }
 0x1cc   : > { %2058 = vmatpush.bf16.msrb.mxu0 %v5119_v48  ;;  %v3273_v48 = vld [vmem:[%s6127_s2 + $0x138] sm:$0xf0]  ;;  %2034 = vmatpush.bf16.msra.mxu2 %v5153_v51  ;;  %v3745_v51 = vld [vmem:[%s6127_s2 + $0x14] sm:$0xf] }
 0x1cd   : > { %v5678_v42 = vor.u32 %v3781_v21, %v3273_v48  ;;  %v3779_v21 = vld [vmem:[%s6127_s2 + $0x124] sm:$0xf]  ;;  %v1301_v48 = vpop.f32.mrf.mxu0  ;;  %v5708_v13 = vor.u32 %v3745_v51, %v3129_v50  ;;  %v1340_v51 = vpop.f32.mrf.mxu3 }
 0x1ce   : > { %v3743_v48 = vld [vmem:[%s6127_s2 + $0x4] sm:$0xf] }
 0x1cf   : > { %6410 = vst [vmem:[#allocation26_spill] sm:$0xff] %v5678_v42  ;;  %1988 = vmatpush.bf16.msrb.mxu3 %v5678_v42  ;;  %1963 = vmatpush.bf16.msrb.mxu1 %v5688_v22 }
 0x1d0   : > { %2059 = vmatpush.bf16.msrb.mxu0 %v5138_v45  ;;  %v3265_v45 = vld [vmem:[%s6127_s2 + $0x128] sm:$0xf0]  ;;  %6412 = vst [vmem:[#allocation30_spill] sm:$0xff] %v5708_v13  ;;  %2035 = vmatpush.bf16.msra.mxu2 %v5171_v47 }
 0x1d1   : > { %v5698_v56 = vor.u32 %v3779_v21, %v3265_v45  ;;  %v1327_v45 = vpop.f32.mrf.mxu2  ;;  %v3121_v47 = vld [vmem:[%s6127_s2 + $0x8] sm:$0xf0] }
 0x1d2   : > { %v5728_v50 = vor.u32 %v3743_v48, %v3121_v47  ;;  %v1274_v45 = vadd.f32 %v5487_v55, %v4856_v44  ;;  %v1339_v47 = vadd.f32 %v1338_v16, %v4893_v53  ;;  %v3821_v55 = vld [vmem:[%s6127_s2 + $0x274] sm:$0xf]  ;;  %v3433_v53 = vld [vmem:[%s6127_s2 + $0x278] sm:$0xf0] }
 0x1d3   : > { %6411 = vst [vmem:[#allocation29_spill] sm:$0xff] %v5698_v56  ;;  %1989 = vmatpush.bf16.msrb.mxu3 %v5698_v56  ;;  %1964 = vmatpush.bf16.msrb.mxu1 %v5708_v13  ;;  %v3417_v16 = vld [vmem:[%s6127_s2 + $0x258] sm:$0xf0] }
 0x1d4   : > { %2060 = vmatpush.bf16.msrb.mxu0 %v5156_v35  ;;  %v3257_v35 = vld [vmem:[%s6127_s2 + $0x118] sm:$0xf0]  ;;  %6414 = vst [vmem:[#allocation34_spill] sm:$0xff] %v5728_v50  ;;  %2036 = vmatpush.bf16.msra.mxu2 %v5195_v30  ;;  %v1287_v30 = vadd.f32 %v5499_v63, %v1274_v45  ;;  %v6429_v45 = vld [vmem:[#allocation13_spill] sm:$0xff] }
 0x1d5   : > { %v5718_v21 = vor.u32 %v3777_v40, %v3257_v35  ;;  %v3775_v40 = vld [vmem:[%s6127_s2 + $0x104] sm:$0xf] }
 0x1d6   : > { %v1300_v48 = vadd.f32 %v1299_v5, %v1287_v30 }
 0x1d7   : > { %6413 = vst [vmem:[#allocation33_spill] sm:$0xff] %v5718_v21  ;;  %1990 = vmatpush.bf16.msrb.mxu3 %v5718_v21  ;;  %1965 = vmatpush.bf16.msrb.mxu1 %v5728_v50 }
 0x1d8   : > { %2061 = vmatpush.bf16.msrb.mxu0 %v5174_v7  ;;  %v3249_v7 = vld [vmem:[%s6127_s2 + $0x108] sm:$0xf0]  ;;  %v1313_v42 = vadd.f32 %v1312_v25, %v1300_v48  ;;  %v6434_v48 = vld [vmem:[#allocation26_spill] sm:$0xff] }
 0x1d9   : > { %v5738_v35 = vor.u32 %v3775_v40, %v3249_v7  ;;  %v3425_v25 = vld [vmem:[%s6127_s2 + $0x268] sm:$0xf0] }
 0x1da   : > { %v1326_v40 = vadd.f32 %v1325_v6, %v1313_v42  ;;  %v3817_v6 = vld [vmem:[%s6127_s2 + $0x254] sm:$0xf] }
 0x1db   : > { %6415 = vst [vmem:[#allocation44_spill] sm:$0xff] %v5738_v35  ;;  %1991 = vmatpush.bf16.msrb.mxu3 %v5738_v35  ;;  %v6430_v30 = vld [vmem:[#allocation34_spill] sm:$0xff] }
 0x1dc   : > { %2062 = vmatpush.bf16.msrb.mxu0 %v5198_v4  ;;  %v1351_v51 = vpop.f32.mrf.mxu0  ;;  %v1394_v8 = vmax.f32 %v1326_v40, 0.0  ;;  %v5909_v40 = vld [vmem:[%s6131_s6] sm:$0xff] }
 0x1dd   : > { %v1364_v21 = vpop.f32.mrf.mxu1  ;;  %v1352_v56 = vadd.f32 %v1351_v51, %v1339_v47 }
 0x1de   : > { %v6436_v47 = vld [vmem:[#allocation33_spill] sm:$0xff] }
 0x1df   : > { %v1365_v52 = vadd.f32 %v1364_v21, %v1352_v56  ;;  %v5755_v56 = vor.u32 %v3821_v55, %v3433_v53  ;;  %v3409_v21 = vld [vmem:[%s6127_s2 + $0x248] sm:$0xf0] }
 0x1e2   : > { %v6437_v51 = vld [vmem:[#allocation44_spill] sm:$0xff] }
 0x1e4   : > { %v1377_v50 = vpop.f32.mrf.mxu2  ;;  %v1353_v4 = vpop.f32.mrf.mxu0 }
 0x1e5   : > { %v1378_v7 = vadd.f32 %v1377_v50, %v1365_v52  ;;  %v1390_v23 = vpop.f32.mrf.mxu3  ;;  %v1366_v39 = vpop.f32.mrf.mxu1  ;;  %v3401_v50 = vld [vmem:[%s6127_s2 + $0x238] sm:$0xf0] }
 0x1e6   : > { %v3819_v39 = vld [vmem:[%s6127_s2 + $0x264] sm:$0xf] }
 0x1e7   : > { %v1391_v35 = vadd.f32 %v1390_v23, %v1378_v7  ;;  %v5774_v42 = vor.u32 %v3819_v39, %v3425_v25  ;;  %v1491_v7 = vperm.slane %v5909_v40, 1  ;;  %v5917_v39 = vld [vmem:[%s6131_s6 + $0x8] sm:$0xff] }
 0x1e8   : > { %v1492_v25 = vperm.slane %v5917_v39, 1 }
 0x1e9   : > { %v1395_v13 = vmax.f32 %v1391_v35, 0.0  ;;  %v3377_v35 = vld [vmem:[%s6127_s2 + $0x208] sm:$0xf0] }
 0x1eb   : > { %v1396_v44 = vmax.f32 %v1394_v8, %v1395_v13  ;;  %v3815_v13 = vld [vmem:[%s6127_s2 + $0x244] sm:$0xf] }
 0x1ec   : > { %v1379_v63 = vpop.f32.mrf.mxu2 }
 0x1ed   : > { %v5753_v5 = vmax.f32 %v5485_v31, %v1396_v44  ;;  %v1392_v52 = vpop.f32.mrf.mxu3 }
 0x1ef   : > { %v5759_v23 = vpack.c.bf16 %v5753_v5, %v5753_v5  ;;  %v1402_v8 = vrot.slane %v5753_v5, 1 }
 0x1f1   : > { %1914 = vmatmul.bf16.vlgmr.msra.gmra.mxu1 %v5759_v23  ;;  %1979 = vmatmul.bf16.vlgmr.msrb.gmra.mxu2 %v5759_v23  ;;  %v5770_v31 = vpack.c.bf16 %v1402_v8, %v1402_v8 }
 0x1f2   : > { %2010 = vmatpush.bf16.msra.mxu1 %v5755_v56  ;;  %2081 = vmatpush.bf16.msrb.mxu2 %v5200_v20  ;;  %v5788_v20 = vor.u32 %v3817_v6, %v3417_v16 }
 0x1f3   : > { %1940 = vmatmul.bf16.vlgmr.msra.gmra.mxu3 %v5770_v31  ;;  %2005 = vmatmul.bf16.vlgmr.msra.gmra.mxu0 %v5770_v31 }
 0x1f4   : > { %2042 = vmatpush.bf16.msra.mxu3 %v5267_v49  ;;  %2107 = vmatpush.bf16.msra.mxu0 %v5281_v26  ;;  %v5800_v49 = vor.u32 %v3815_v13, %v3409_v21  ;;  %v3813_v26 = vld [vmem:[%s6127_s2 + $0x234] sm:$0xf] }
 0x1f6   : > { %2011 = vmatpush.bf16.msra.mxu1 %v5774_v42  ;;  %2082 = vmatpush.bf16.msrb.mxu2 %v5216_v28 }
 0x1f8   : > { %2043 = vmatpush.bf16.msra.mxu3 %v5306_v36  ;;  %2108 = vmatpush.bf16.msra.mxu0 %v5308_v15  ;;  %v3811_v36 = vld [vmem:[%s6127_s2 + $0x224] sm:$0xf]  ;;  %v3393_v15 = vld [vmem:[%s6127_s2 + $0x228] sm:$0xf0] }
 0x1fa   : > { %2012 = vmatpush.bf16.msra.mxu1 %v5788_v20  ;;  %2083 = vmatpush.bf16.msrb.mxu2 %v5229_v3  ;;  %v5814_v3 = vor.u32 %v3813_v26, %v3401_v50 }
 0x1fc   : > { %v5802_v28 = vpop.f32.mrf.mxu0  ;;  %2044 = vmatpush.bf16.msra.mxu3 %v5345_v41  ;;  %2109 = vmatpush.bf16.msra.mxu0 %v5355_v18 }
 0x1fd   : > { %v1903_v4 = vadd.f32 %v5802_v28, %v1491_v7 }
 0x1fe   : > { %2013 = vmatpush.bf16.msra.mxu1 %v5800_v49  ;;  %2084 = vmatpush.bf16.msrb.mxu2 %v5238_v54  ;;  %v5830_v54 = vor.u32 %v3811_v36, %v3393_v15 }
 0x200   : > { %2045 = vmatpush.bf16.msra.mxu3 %v5385_v24  ;;  %2110 = vmatpush.bf16.msra.mxu0 %v5394_v19  ;;  %v3809_v24 = vld [vmem:[%s6127_s2 + $0x214] sm:$0xf]  ;;  %v3807_v19 = vld [vmem:[%s6127_s2 + $0x204] sm:$0xf] }
 0x201   : > { %1966 = vmatmul.bf16.vlgmr.msrb.gmra.mxu1 %v5214_v11  ;;  %2037 = vmatmul.bf16.vlgmr.msra.gmra.mxu2 %v5759_v23  ;;  %v3385_v11 = vld [vmem:[%s6127_s2 + $0x218] sm:$0xf0] }
 0x202   : > { %2014 = vmatpush.bf16.msra.mxu1 %v5814_v3  ;;  %2085 = vmatpush.bf16.msrb.mxu2 %v5249_v62  ;;  %v3388_v62 = vor.u32 %v3809_v24, %v3385_v11 }
 0x203   : > { %1992 = vmatmul.bf16.vlgmr.msrb.gmra.mxu3 %v5218_v14  ;;  %2063 = vmatmul.bf16.vlgmr.msrb.gmra.mxu0 %v5770_v31 }
 0x204   : > { %v5826_v41 = vpop.f32.mrf.mxu2  ;;  %v1904_v18 = vpop.f32.mrf.mxu0  ;;  %2046 = vmatpush.bf16.msra.mxu3 %v5415_v37  ;;  %2111 = vmatpush.bf16.msra.mxu0 %v5423_v9  ;;  %v3380_v9 = vor.u32 %v3807_v19, %v3377_v35  ;;  %v3829_v35 = vld [vmem:[%s6128_s3 + $0x30] sm:$0xff] }
 0x205   : > { %v3830_v18 = vld [vmem:[%s6128_s3 + $0x38] sm:$0xff] }
 0x206   : > { %2015 = vmatpush.bf16.msra.mxu1 %v5830_v54  ;;  %2086 = vmatpush.bf16.msrb.mxu2 %v5289_v46  ;;  %v2026_v46 = vrot.slane %v5753_v5, 2 }
 0x208   : > { %2047 = vmatpush.bf16.msra.mxu3 %v5478_v60  ;;  %2112 = vmatpush.bf16.msra.mxu0 %v5480_v58  ;;  %v2028_v60 = vpack.c.bf16 %v2026_v46, %v2026_v46  ;;  %v6423_v58 = vld [vmem:[#allocation40_spill] sm:$0xff] }
 0x20a   : > { %2016 = vmatpush.bf16.msra.mxu1 %v3388_v62  ;;  %2087 = vmatpush.bf16.msrb.mxu2 %v5336_v38  ;;  %v6416_v38 = vld [vmem:[#allocation41_spill] sm:$0xff] }
 0x20c   : > { %v1930_v37 = vpop.f32.mrf.mxu2  ;;  %2048 = vmatpush.bf16.msra.mxu3 %v5514_v0  ;;  %2113 = vmatpush.bf16.msra.mxu0 %v5526_v34  ;;  %v6420_v34 = vld [vmem:[#allocation35_spill] sm:$0xff] }
 0x20d   : > { %v6422_v0 = vld [vmem:[#allocation39_spill] sm:$0xff] }
 0x20e   : > { %2017 = vmatpush.bf16.msra.mxu1 %v3380_v9  ;;  %2088 = vmatpush.bf16.msrb.mxu2 %v5381_v59  ;;  %v6418_v59 = vld [vmem:[#allocation32_spill] sm:$0xff] }
 0x210   : > { %2049 = vmatpush.bf16.msra.mxu3 %v5553_v29  ;;  %2114 = vmatpush.bf16.msra.mxu0 %v5564_v2  ;;  %v6424_v29 = vld [vmem:[#allocation42_spill] sm:$0xff]  ;;  %v6425_v2 = vld [vmem:[#allocation9_spill] sm:$0xff] }
 0x211   : > { %2018 = vmatmul.bf16.vlgmr.msra.gmra.mxu1 %v5417_v17  ;;  %2089 = vmatmul.bf16.vlgmr.msrb.gmra.mxu2 %v2028_v60 }
 0x212   : > { %2068 = vmatpush.bf16.msrb.mxu1 %v5283_v10  ;;  %2133 = vmatpush.bf16.msra.mxu2 %v5387_v32  ;;  %v6417_v10 = vld [vmem:[#allocation37_spill] sm:$0xff] }
 0x213   : > { %2050 = vmatmul.bf16.vlgmr.msra.gmra.mxu3 %v5218_v14  ;;  %2115 = vmatmul.bf16.vlgmr.msra.gmra.mxu0 %v5218_v14 }
 0x214   : > { %2094 = vmatpush.bf16.msrb.mxu3 %v5566_v61  ;;  %v6419_v61 = vld [vmem:[#allocation38_spill] sm:$0xff]  ;;  %2500 = vmatpush.bf16.msrb.mxu0 %v3830_v18 }
 0x216   : > { %2069 = vmatpush.bf16.msrb.mxu1 %v5318_v33  ;;  %2134 = vmatpush.bf16.msra.mxu2 %v6416_v38  ;;  %v6421_v33 = vld [vmem:[#allocation36_spill] sm:$0xff] }
 0x218   : > { %2095 = vmatpush.bf16.msrb.mxu3 %v5603_v1  ;;  %v6426_v1 = vld [vmem:[#allocation30_spill] sm:$0xff]  ;;  %2501 = vmatpush.bf16.msrb.mxu0 %v3829_v35 }
 0x219   : > { %v3870_v35 = vld [vmem:[%s6129_s4 + $0x38] sm:$0xff] }
 0x21a   : > { %2070 = vmatpush.bf16.msrb.mxu1 %v6417_v10  ;;  %2135 = vmatpush.bf16.msra.mxu2 %v6418_v59 }
 0x21c   : > { %v5870_v32 = vpop.f32.mrf.mxu0  ;;  %2096 = vmatpush.bf16.msrb.mxu3 %v5625_v12  ;;  %v6427_v12 = vld [vmem:[#allocation10_spill] sm:$0xff] }
 0x21e   : > { %2071 = vmatpush.bf16.msrb.mxu1 %v6419_v61  ;;  %2136 = vmatpush.bf16.msra.mxu2 %v6420_v34  ;;  %v3827_v34 = vld [vmem:[%s6128_s3 + $0x20] sm:$0xff] }
 0x220   : > { %2097 = vmatpush.bf16.msrb.mxu3 %v5648_v57  ;;  %v6428_v57 = vld [vmem:[#allocation14_spill] sm:$0xff] }
 0x222   : > { %2072 = vmatpush.bf16.msrb.mxu1 %v6421_v33  ;;  %2137 = vmatpush.bf16.msra.mxu2 %v6422_v0  ;;  %v3838_v33 = vld [vmem:[%s6128_s3 + $0x78] sm:$0xff] }
 0x223   : > { %v3846_v0 = vld [vmem:[%s6128_s3 + $0xb8] sm:$0xff] }
 0x224   : > { %v1956_v14 = vpop.f32.mrf.mxu0  ;;  %2098 = vmatpush.bf16.msrb.mxu3 %v5668_v43  ;;  %v6431_v43 = vld [vmem:[#allocation21_spill] sm:$0xff] }
 0x225   : > { %v3854_v14 = vld [vmem:[%s6128_s3 + $0xf8] sm:$0xff] }
 0x226   : > { %2073 = vmatpush.bf16.msrb.mxu1 %v6423_v58  ;;  %2138 = vmatpush.bf16.msra.mxu2 %v6424_v29  ;;  %v3826_v58 = vld [vmem:[%s6128_s3 + $0x18] sm:$0xff] }
 0x228   : > { %2099 = vmatpush.bf16.msrb.mxu3 %v5688_v22  ;;  %v6433_v22 = vld [vmem:[#allocation25_spill] sm:$0xff] }
 0x22a   : > { %2074 = vmatpush.bf16.msrb.mxu1 %v6425_v2  ;;  %2139 = vmatpush.bf16.msra.mxu2 %v5541_v27  ;;  %v6432_v27 = vld [vmem:[#allocation22_spill] sm:$0xff]  ;;  %v3837_v2 = vld [vmem:[%s6128_s3 + $0x70] sm:$0xff] }
 0x22c   : > { %2100 = vmatpush.bf16.msrb.mxu3 %v6426_v1  ;;  %v3845_v1 = vld [vmem:[%s6128_s3 + $0xb0] sm:$0xff] }
 0x22e   : > { %2075 = vmatpush.bf16.msrb.mxu1 %v6427_v12  ;;  %2140 = vmatpush.bf16.msra.mxu2 %v6428_v57  ;;  %v3853_v12 = vld [vmem:[%s6128_s3 + $0xf0] sm:$0xff] }
 0x230   : > { %2101 = vmatpush.bf16.msrb.mxu3 %v6430_v30  ;;  %v3836_v30 = vld [vmem:[%s6128_s3 + $0x68] sm:$0xff] }
 0x231   : > { %2076 = vmatmul.bf16.vlgmr.msrb.gmra.mxu1 %v5417_v17  ;;  %2141 = vmatmul.bf16.vlgmr.msra.gmra.mxu2 %v5417_v17  ;;  %v6435_v17 = vld [vmem:[#allocation29_spill] sm:$0xff] }
 0x232   : > { %2120 = vmatpush.bf16.msra.mxu1 %v6429_v45  ;;  %2526 = vmatpush.bf16.msrb.mxu2 %v3846_v0  ;;  %v3825_v45 = vld [vmem:[%s6128_s3 + $0x10] sm:$0xff] }
 0x233   : > { %2102 = vmatmul.bf16.vlgmr.msrb.gmra.mxu3 %v5759_v23 }
 0x234   : > { %2146 = vmatpush.bf16.msra.mxu3 %v5755_v56 }
 0x236   : > { %2121 = vmatpush.bf16.msra.mxu1 %v6431_v43  ;;  %2527 = vmatpush.bf16.msrb.mxu2 %v3845_v1  ;;  %v3844_v43 = vld [vmem:[%s6128_s3 + $0xa8] sm:$0xff] }
 0x238   : > { %2147 = vmatpush.bf16.msra.mxu3 %v5774_v42 }
 0x23a   : > { %2122 = vmatpush.bf16.msra.mxu1 %v6432_v27  ;;  %v3852_v27 = vld [vmem:[%s6128_s3 + $0xe8] sm:$0xff]  ;;  %2528 = vmatpush.bf16.msrb.mxu2 %v3844_v43 }
 0x23b   : > { %v3864_v43 = vld [vmem:[%s6129_s4 + $0x8] sm:$0xff] }
 0x23c   : > { %2148 = vmatpush.bf16.msra.mxu3 %v5788_v20 }
 0x23e   : > { %2123 = vmatpush.bf16.msra.mxu1 %v6433_v22  ;;  %v3824_v22 = vld [vmem:[%s6128_s3 + $0x8] sm:$0xff] }
 0x240   : > { %2149 = vmatpush.bf16.msra.mxu3 %v5800_v49 }
 0x242   : > { %2124 = vmatpush.bf16.msra.mxu1 %v6434_v48  ;;  %v3835_v48 = vld [vmem:[%s6128_s3 + $0x60] sm:$0xff] }
 0x244   : > { %2150 = vmatpush.bf16.msra.mxu3 %v5814_v3 }
 0x246   : > { %2125 = vmatpush.bf16.msra.mxu1 %v6435_v17  ;;  %v3843_v17 = vld [vmem:[%s6128_s3 + $0xa0] sm:$0xff] }
 0x247   : > { %2529 = vmatpush.bf16.msrb.mxu2 %v3843_v17  ;;  %v3876_v17 = vld [vmem:[%s6130_s5 + $0x28] sm:$0xff] }
 0x248   : > { %2151 = vmatpush.bf16.msra.mxu3 %v5830_v54 }
 0x24a   : > { %2126 = vmatpush.bf16.msra.mxu1 %v6436_v47  ;;  %v3851_v47 = vld [vmem:[%s6128_s3 + $0xe0] sm:$0xff] }
 0x24c   : > { %2152 = vmatpush.bf16.msra.mxu3 %v3388_v62 }
 0x24e   : > { %2127 = vmatpush.bf16.msra.mxu1 %v6437_v51  ;;  %v3823_v51 = vld [vmem:[%s6128_s3] sm:$0xff] }
 0x250   : > { %2153 = vmatpush.bf16.msra.mxu3 %v3380_v9  ;;  %v3828_v9 = vld [vmem:[%s6128_s3 + $0x28] sm:$0xff] }
 0x251   : > { %2128 = vmatmul.bf16.vlgmr.msra.gmra.mxu1 %v5770_v31  ;;  %2502 = vmatpush.bf16.msrb.mxu0 %v3828_v9  ;;  %v3869_v9 = vld [vmem:[%s6129_s4 + $0x30] sm:$0xff] }
 0x252   : > { %2513 = vmatpush.bf16.msrb.mxu1 %v3838_v33 }
 0x253   : > { %2154 = vmatmul.bf16.vlgmr.msra.gmra.mxu3 %v2028_v60 }
 0x254   : > { %2539 = vmatpush.bf16.msrb.mxu3 %v3854_v14 }
 0x255   : > { %2503 = vmatpush.bf16.msrb.mxu0 %v3827_v34 }
 0x256   : > { %2514 = vmatpush.bf16.msrb.mxu1 %v3837_v2 }
 0x258   : > { %2540 = vmatpush.bf16.msrb.mxu3 %v3853_v12 }
 0x259   : > { %2504 = vmatpush.bf16.msrb.mxu0 %v3826_v58 }
 0x25a   : > { %2515 = vmatpush.bf16.msrb.mxu1 %v3836_v30  ;;  %v3865_v30 = vld [vmem:[%s6129_s4 + $0x10] sm:$0xff] }
 0x25c   : > { %2541 = vmatpush.bf16.msrb.mxu3 %v3852_v27  ;;  %v3863_v27 = vld [vmem:[%s6129_s4] sm:$0xff] }
 0x25d   : > { %2505 = vmatpush.bf16.msrb.mxu0 %v3825_v45  ;;  %v3866_v45 = vld [vmem:[%s6129_s4 + $0x18] sm:$0xff] }
 0x25e   : > { %2516 = vmatpush.bf16.msrb.mxu1 %v3835_v48  ;;  %v3877_v48 = vld [vmem:[%s6130_s5 + $0x30] sm:$0xff] }
 0x260   : > { %2542 = vmatpush.bf16.msrb.mxu3 %v3851_v47 }
 0x261   : > { %2506 = vmatpush.bf16.msrb.mxu0 %v3824_v22  ;;  %v3878_v22 = vld [vmem:[%s6130_s5 + $0x38] sm:$0xff] }
 0x265   : > { %2507 = vmatpush.bf16.msrb.mxu0 %v3823_v51  ;;  %v2498_v51 = vrot.slane %v5909_v40, 2 }
 0x26e   : > { %v1915_v44 = vpop.f32.mrf.mxu1 }
 0x26f   : > { %v1916_v55 = vadd.f32 %v1915_v44, %v1903_v4  ;;  %v3834_v44 = vld [vmem:[%s6128_s3 + $0x58] sm:$0xff] }
 0x270   : > { %v2006_v53 = vpop.f32.mrf.mxu0  ;;  %2517 = vmatpush.bf16.msrb.mxu1 %v3834_v44 }
 0x271   : > { %v1929_v5 = vadd.f32 %v5826_v41, %v1916_v55  ;;  %v3842_v55 = vld [vmem:[%s6128_s3 + $0x98] sm:$0xff] }
 0x272   : > { %2530 = vmatpush.bf16.msrb.mxu2 %v3842_v55  ;;  %v3874_v55 = vld [vmem:[%s6130_s5 + $0x18] sm:$0xff] }
 0x274   : > { %v1980_v63 = vpop.f32.mrf.mxu2 }
 0x276   : > { %v1917_v52 = vpop.f32.mrf.mxu1  ;;  %v1941_v56 = vpop.f32.mrf.mxu3 }
 0x277   : > { %v1942_v23 = vadd.f32 %v1941_v56, %v1929_v5  ;;  %v3833_v52 = vld [vmem:[%s6128_s3 + $0x50] sm:$0xff] }
 0x278   : > { %v2008_v8 = vpop.f32.mrf.mxu0  ;;  %v3841_v56 = vld [vmem:[%s6128_s3 + $0x90] sm:$0xff]  ;;  %2518 = vmatpush.bf16.msrb.mxu1 %v3833_v52 }
 0x279   : > { %v1955_v15 = vadd.f32 %v5870_v32, %v1942_v23  ;;  %v3849_v23 = vld [vmem:[%s6128_s3 + $0xd0] sm:$0xff]  ;;  %2531 = vmatpush.bf16.msrb.mxu2 %v3841_v56 }
 0x27b   : > { %v2023_v11 = vmax.f32 %v1955_v15, 0.0  ;;  %v3856_v15 = vld [vmem:[%s6128_s3 + $0x108] sm:$0xff] }
 0x27c   : > { %v1982_v31 = vpop.f32.mrf.mxu2 }
 0x27e   : > { %v1943_v42 = vpop.f32.mrf.mxu3  ;;  %v1967_v6 = vpop.f32.mrf.mxu1 }
 0x27f   : > { %v1968_v16 = vadd.f32 %v1967_v6, %v1492_v25  ;;  %v3860_v42 = vld [vmem:[%s6128_s3 + $0x128] sm:$0xff] }
 0x280   : > { %v2064_v20 = vpop.f32.mrf.mxu0  ;;  %v3832_v6 = vld [vmem:[%s6128_s3 + $0x48] sm:$0xff] }
 0x281   : > { %v1981_v13 = vadd.f32 %v1980_v63, %v1968_v16  ;;  %v3861_v63 = vld [vmem:[%s6128_s3 + $0x130] sm:$0xff]  ;;  %v3840_v16 = vld [vmem:[%s6128_s3 + $0x88] sm:$0xff]  ;;  %2519 = vmatpush.bf16.msrb.mxu1 %v3832_v6 }
 0x282   : > { %2532 = vmatpush.bf16.msrb.mxu2 %v3840_v16 }
 0x284   : > { %v2038_v21 = vpop.f32.mrf.mxu2 }
 0x285   : > { %v2039_v60 = vadd.f32 %v2038_v21, %v1491_v7  ;;  %v3862_v7 = vld [vmem:[%s6128_s3 + $0x138] sm:$0xff] }
 0x286   : > { %v1969_v49 = vpop.f32.mrf.mxu1  ;;  %v1993_v28 = vpop.f32.mrf.mxu3  ;;  %2552 = vmatpush.bf16.msra.mxu0 %v3862_v7 }
 0x287   : > { %v1994_v26 = vadd.f32 %v1993_v28, %v1981_v13  ;;  %v3859_v13 = vld [vmem:[%s6128_s3 + $0x120] sm:$0xff] }
 0x288   : > { %v2066_v50 = vpop.f32.mrf.mxu0  ;;  %v3831_v49 = vld [vmem:[%s6128_s3 + $0x40] sm:$0xff] }
 0x289   : > { %v2007_v3 = vadd.f32 %v2006_v53, %v1994_v26  ;;  %v3850_v53 = vld [vmem:[%s6128_s3 + $0xd8] sm:$0xff]  ;;  %v3839_v28 = vld [vmem:[%s6128_s3 + $0x80] sm:$0xff]  ;;  %2520 = vmatpush.bf16.msrb.mxu1 %v3831_v49 }
 0x28a   : > { %2543 = vmatpush.bf16.msrb.mxu3 %v3850_v53  ;;  %2553 = vmatpush.bf16.msra.mxu0 %v3861_v63  ;;  %v3847_v26 = vld [vmem:[%s6128_s3 + $0xc0] sm:$0xff] }
 0x28b   : > { %2533 = vmatpush.bf16.msrb.mxu2 %v3839_v28  ;;  %v3872_v28 = vld [vmem:[%s6130_s5 + $0x8] sm:$0xff] }
 0x28c   : > { %v2040_v36 = vpop.f32.mrf.mxu2 }
 0x28d   : > { %v3857_v36 = vld [vmem:[%s6128_s3 + $0x110] sm:$0xff]  ;;  %2633 = vmatpush.bf16.msra.mxu1 %v3870_v35 }
 0x28e   : > { %v1995_v41 = vpop.f32.mrf.mxu3  ;;  %v2019_v54 = vpop.f32.mrf.mxu1  ;;  %2544 = vmatpush.bf16.msrb.mxu3 %v3849_v23  ;;  %2554 = vmatpush.bf16.msra.mxu0 %v3860_v42  ;;  %v3873_v23 = vld [vmem:[%s6130_s5 + $0x10] sm:$0xff] }
 0x28f   : > { %v2020_v24 = vadd.f32 %v2019_v54, %v2007_v3  ;;  %v3858_v3 = vld [vmem:[%s6128_s3 + $0x118] sm:$0xff]  ;;  %v3855_v41 = vld [vmem:[%s6128_s3 + $0x100] sm:$0xff]  ;;  %2714 = vmatpush.bf16.msra.mxu2 %v3878_v22 }
 0x290   : > { %v5926_v19 = vpop.f32.mrf.mxu0 }
 0x291   : > { %v2024_v62 = vmax.f32 %v2020_v24, 0.0  ;;  %2634 = vmatpush.bf16.msra.mxu1 %v3869_v9 }
 0x292   : > { %2555 = vmatpush.bf16.msra.mxu0 %v3859_v13 }
 0x293   : > { %v5931_v37 = vmax.f32 %v2023_v11, %v2024_v62  ;;  %2715 = vmatpush.bf16.msra.mxu2 %v3877_v48 }
 0x294   : > { %v5936_v46 = vpop.f32.mrf.mxu2 }
 0x296   : > { %v2021_v38 = vpop.f32.mrf.mxu1  ;;  %v2051_v10 = vpop.f32.mrf.mxu3  ;;  %2556 = vmatpush.bf16.msra.mxu0 %v3858_v3 }
 0x297   : > { %v2052_v59 = vadd.f32 %v2051_v10, %v2039_v60  ;;  %2716 = vmatpush.bf16.msra.mxu2 %v3876_v17 }
 0x298   : > { %v2118_v32 = vpop.f32.mrf.mxu0 }
 0x299   : > { %v5938_v61 = vadd.f32 %v2064_v20, %v2052_v59  ;;  %v3848_v20 = vld [vmem:[%s6128_s3 + $0xc8] sm:$0xff] }
 0x29a   : > { %2545 = vmatpush.bf16.msrb.mxu3 %v3848_v20  ;;  %2557 = vmatpush.bf16.msra.mxu0 %v3857_v36 }
 0x29c   : > { %v2092_v29 = vpop.f32.mrf.mxu2 }
 0x29e   : > { %v2053_v57 = vpop.f32.mrf.mxu3  ;;  %2546 = vmatpush.bf16.msrb.mxu3 %v3847_v26  ;;  %2558 = vmatpush.bf16.msra.mxu0 %v3856_v15  ;;  %v3871_v26 = vld [vmem:[%s6130_s5] sm:$0xff] }
 0x29f   : > { %v3868_v57 = vld [vmem:[%s6129_s4 + $0x28] sm:$0xff] }
 0x2a0   : > { %2635 = vmatpush.bf16.msra.mxu1 %v3868_v57 }
 0x2a2   : > { %2559 = vmatpush.bf16.msra.mxu0 %v3855_v41 }
 0x2ae   : > { %v2077_v4 = vpop.f32.mrf.mxu1 }
 0x2af   : > { %v2078_v11 = vadd.f32 %v2077_v4, %v5938_v61  ;;  %v3875_v4 = vld [vmem:[%s6130_s5 + $0x20] sm:$0xff] }
 0x2b0   : > { %2717 = vmatpush.bf16.msra.mxu2 %v3875_v4 }
 0x2b1   : > { %v2091_v60 = vadd.f32 %v5936_v46, %v2078_v11 }
 0x2b4   : > { %v2142_v5 = vpop.f32.mrf.mxu2  ;;  %2718 = vmatpush.bf16.msra.mxu2 %v3874_v55 }
 0x2b6   : > { %v2079_v8 = vpop.f32.mrf.mxu1  ;;  %v2103_v31 = vpop.f32.mrf.mxu3 }
 0x2b7   : > { %v2104_v54 = vadd.f32 %v2103_v31, %v1492_v25 }
 0x2b8   : > { %2719 = vmatpush.bf16.msra.mxu2 %v3873_v23 }
 0x2b9   : > { %v2117_v24 = vadd.f32 %v5926_v19, %v2104_v54  ;;  %v2159_v19 = vmax.f32 %v2091_v60, 0.0 }
 0x2bc   : > { %v2144_v21 = vpop.f32.mrf.mxu2  ;;  %2720 = vmatpush.bf16.msra.mxu2 %v3872_v28 }
 0x2be   : > { %v2105_v50 = vpop.f32.mrf.mxu3 }
 0x2bf   : > { %v2631_v50 = vrot.slane %v5909_v40, 3 }
 0x2c0   : > { %2721 = vmatpush.bf16.msra.mxu2 %v3871_v26 }
 0x2ce   : > { %v2129_v18 = vpop.f32.mrf.mxu1 }
 0x2cf   : > { %v2130_v62 = vadd.f32 %v2129_v18, %v2117_v24  ;;  %v2712_v18 = vrot.slane %v5909_v40, 4 }
 0x2d1   : > { %v2143_v25 = vadd.f32 %v2142_v5, %v2130_v62 }
 0x2d6   : > { %v2131_v39 = vpop.f32.mrf.mxu1  ;;  %v2155_v38 = vpop.f32.mrf.mxu3 }
 0x2d7   : > { %v2156_v10 = vadd.f32 %v2155_v38, %v2143_v25 }
 0x2d9   : > { %v2160_v59 = vmax.f32 %v2156_v10, 0.0 }
 0x2db   : > { %v2161_v32 = vmax.f32 %v2159_v19, %v2160_v59 }
 0x2dd   : > { %v2162_v61 = vmax.f32 %v5931_v37, %v2161_v32  ;;  %v3867_v37 = vld [vmem:[%s6129_s4 + $0x20] sm:$0xff] }
 0x2de   : > { %v2157_v34 = vpop.f32.mrf.mxu3  ;;  %2636 = vmatpush.bf16.msra.mxu1 %v3867_v37 }
 0x2df   : > { %v2172_v33 = vpack.c.bf16 %v2162_v61, %v2162_v61  ;;  %v2164_v0 = vrot.slane %v2162_v61, 1  ;;  %v2166_v14 = vrot.slane %v2162_v61, 2  ;;  %v2168_v58 = vrot.slane %v2162_v61, 3 }
 0x2e0   : > { %v2170_v46 = vrot.slane %v2162_v61, 4 }
 0x2e1   : > { %2508 = vmatmul.bf16.vlgmr.msrb.gmra.mxu0 %v2172_v33  ;;  %v2173_v29 = vpack.c.bf16 %v2164_v0, %v2164_v0  ;;  %v2174_v2 = vpack.c.bf16 %v2166_v14, %v2166_v14  ;;  %v2175_v1 = vpack.c.bf16 %v2168_v58, %v2168_v58 }
 0x2e2   : > { %v2176_v12 = vpack.c.bf16 %v2170_v46, %v2170_v46  ;;  %2637 = vmatpush.bf16.msra.mxu1 %v3866_v45 }
 0x2e3   : > { %2521 = vmatmul.bf16.vlgmr.msrb.gmra.mxu1 %v2173_v29  ;;  %2534 = vmatmul.bf16.vlgmr.msrb.gmra.mxu2 %v2174_v2 }
 0x2e4   : > { %2547 = vmatmul.bf16.vlgmr.msrb.gmra.mxu3 %v2175_v1 }
 0x2e6   : > { %2638 = vmatpush.bf16.msra.mxu1 %v3865_v30 }
 0x2ea   : > { %2639 = vmatpush.bf16.msra.mxu1 %v3864_v43 }
 0x2ee   : > { %2640 = vmatpush.bf16.msra.mxu1 %v3863_v27 }
 0x2f1   : > { %2560 = vmatmul.bf16.vlgmr.msra.gmra.mxu0 %v2176_v12 }
 0x35e   : > { %v2509_v47 = vpop.f32.mrf.mxu0 }
 0x35f   : > { %v2510_v44 = vadd.f32 %v2509_v47, %v2498_v51 }
 0x360   : > { %v2522_v7 = vpop.f32.mrf.mxu1 }
 0x361   : > { %v2523_v5 = vadd.f32 %v2522_v7, %v2510_v44 }
 0x366   : > { %v2511_v53 = vpop.f32.mrf.mxu0  ;;  %v2535_v63 = vpop.f32.mrf.mxu2 }
 0x367   : > { %v2548_v52 = vpop.f32.mrf.mxu3  ;;  %v2536_v8 = vadd.f32 %v2535_v63, %v2523_v5 }
 0x368   : > { %v2524_v56 = vpop.f32.mrf.mxu1 }
 0x369   : > { %v2549_v31 = vadd.f32 %v2548_v52, %v2536_v8 }
 0x36e   : > { %v2537_v42 = vpop.f32.mrf.mxu2  ;;  %v2561_v6 = vpop.f32.mrf.mxu0 }
 0x36f   : > { %v2550_v16 = vpop.f32.mrf.mxu3  ;;  %v2562_v20 = vadd.f32 %v2561_v6, %v2549_v31 }
 0x371   : > { %v2565_v13 = vmax.f32 %v2562_v20, 0.0 }
 0x373   : > { %v2566_v21 = vpack.c.bf16 %v2565_v13, %v2565_v13 }
 0x375   : > { %2641 = vmatmul.bf16.vlgmr.msra.gmra.mxu1 %v2566_v21 }
 0x376   : > { %v2563_v49 = vpop.f32.mrf.mxu0 }
 0x3f2   : > { %v2642_v3 = vpop.f32.mrf.mxu1 }
 0x3f3   : > { %v2643_v36 = vadd.f32 %v2642_v3, %v2631_v50 }
 0x3f5   : > { %v2646_v15 = vmax.f32 %v2643_v36, 0.0 }
 0x3f7   : > { %v2647_v41 = vpack.c.bf16 %v2646_v15, %v2646_v15 }
 0x3f9   : > { %2722 = vmatmul.bf16.vlgmr.msra.gmra.mxu2 %v2647_v41 }
 0x3fa   : > { %v2644_v54 = vpop.f32.mrf.mxu1 }
 0x47c   : > { %v2723_v24 = vpop.f32.mrf.mxu2 }
 0x47d   : > { %v2724_v11 = vadd.f32 %v2723_v24, %v2712_v18 }
 0x47f   : > { %v2727_v62 = vperm.slane %v2724_v11, 0 }
 0x481   : > { %2728 = vst [vmem:[%s331_s18] sm:$0xff] %v2727_v62 }
 0x484   : > { %v2725_v35 = vpop.f32.mrf.mxu2 }
 0x485 PF: > { %p14_p9 = scmp.ge.s32.totalorder %s3986_s28, 4   ;;  %s6438_s24 = smov %s3923_s25 }
 0x486   : > { %s6439_s25 = smov %s3995_s8  ;;  %s6440_s26 = smov %s3986_s28 }
 0x487   :  { %16 = sbr.rel (!%p14_p9) target bundleno = 2 (0x2), region = 124 }

</bundles_post_ra>
